<compile_context>
chip_gen: v7x
topology: tpu7x:2x2x1
jax: 0.10.0
libtpu: 0.0.40
codegen_flags: <defaults>
</compile_context>

<pallas_src>
import jax
import jax.numpy as jnp
from jax.experimental import pallas as pl
from jax.experimental.pallas import tpu as pltpu


# ----------------------------- Pallas kernel --------------------------------

def _decoder_fused_kernel(x_ref, w1_ref, b1_ref, w2_ref, b2_ref, o_ref):
    # Layer 1 (tiny): bf16 x bf16 MXU dot, f32 accumulation, f32 bias + tanh.
    # x/w1/b1 blocks are grid-invariant so they are DMA'd once per core.
    x_bf = x_ref[...].astype(jnp.bfloat16)
    h = jnp.tanh(
        jnp.dot(x_bf, w1_ref[...], preferred_element_type=jnp.float32)
        + b1_ref[...]
    )
    # Layer 2: full-K dot against this lane-dense N tile of w2 (bf16 weights,
    # bf16 activations, f32 accumulation), bias fused.
    y = jnp.dot(h.astype(jnp.bfloat16), w2_ref[...],
                preferred_element_type=jnp.float32) + b2_ref[...]
    o_ref[...] = y.astype(o_ref.dtype)


# ------------------------------ helpers --------------------------------------

def _round_up(n, m):
    return ((n + m - 1) // m) * m


def _pad2d(a, rows, cols):
    r, c = a.shape
    if r == rows and c == cols:
        return a
    return jnp.pad(a, ((0, rows - r), (0, cols - c)))


def _pick_tile(d2p, max_tn=1024):
    """Largest multiple of 128 (<= max_tn) that divides d2p exactly.
    d2p is already a multiple of 128, so this always terminates."""
    t = min(max_tn, d2p)
    t = (t // 128) * 128
    while d2p % t != 0:
        t -= 128
    return t


# ----------------------------- Decoder module -------------------------------

def init_decoder_params(key, p_dims):
    """Deterministic init matching the PyTorch module:
    xavier_uniform_ on weights, Normal(0, 0.001) on biases.
    Weights stored as (in, out) for y = x @ W + b."""
    k1, k2, k3, k4 = jax.random.split(key, 4)

    def xavier(k, fan_in, fan_out):
        bound = (6.0 / (fan_in + fan_out)) ** 0.5
        # PyTorch weight is (out, in); we store (in, out).
        w_torch = jax.random.uniform(
            k, (fan_out, fan_in), jnp.float32, minval=-bound, maxval=bound
        )
        return w_torch.T

    w1 = xavier(k1, p_dims[0], p_dims[1])
    b1 = 0.001 * jax.random.normal(k2, (p_dims[1],), jnp.float32)
    w2 = xavier(k3, p_dims[1], p_dims[2])
    b2 = 0.001 * jax.random.normal(k4, (p_dims[2],), jnp.float32)
    return {"w1": w1, "b1": b1, "w2": w2, "b2": b2}


def pad_decoder_params(params, *, max_tn=1024):
    """Pad weights/biases to tile-aligned shapes ONCE (stays in HBM) and cast
    weights to bfloat16 (halves the HBM traffic this kernel is bound on).
    Biases stay float32. Returns (padded_params, tn)."""
    d0, d1 = params["w1"].shape
    _, d2 = params["w2"].shape
    d1p = _round_up(d1, 128)            # hidden dim padded -> lane-dense h
    d2p = _round_up(d2, 128)            # pad to 128 first, then tile exactly
    tn = _pick_tile(d2p, max_tn)
    padded = {
        # w1: pad only the output dim; d0 stays as-is (block == full array).
        "w1": _pad2d(params["w1"], d0, d1p).astype(jnp.bfloat16),
        "b1": _pad2d(params["b1"].reshape(1, d1), 1, d1p),
        "w2": _pad2d(params["w2"], d1p, d2p).astype(jnp.bfloat16),
        "b2": _pad2d(params["b2"].reshape(1, d2), 1, d2p),
    }
    return padded, tn


def decoder_forward(pparams, x, d2, tn):
    """Fused Decoder forward: y = tanh(x @ w1 + b1) @ w2 + b2.

    pparams: pre-padded params (from pad_decoder_params; bf16 weights)
    x: (B, d0) float32 — passed straight through, no per-call padding
    d2: static unpadded output dim
    tn: static N tile width (multiple of 128, divides padded d2)
    """
    w1, b1, w2, b2 = pparams["w1"], pparams["b1"], pparams["w2"], pparams["b2"]
    B, d0 = x.shape
    d1p = w1.shape[1]
    d2p = w2.shape[1]

    grid = (d2p // tn,)

    out_p = pl.pallas_call(
        _decoder_fused_kernel,
        out_shape=jax.ShapeDtypeStruct((B, d2p), x.dtype),
        grid_spec=pltpu.PrefetchScalarGridSpec(
            num_scalar_prefetch=0,
            grid=grid,
            in_specs=[
                pl.BlockSpec((B, d0), lambda j: (0, 0)),     # x   full array
                pl.BlockSpec((d0, d1p), lambda j: (0, 0)),   # w1  full array
                pl.BlockSpec((1, d1p), lambda j: (0, 0)),    # b1  full array
                pl.BlockSpec((d1p, tn), lambda j: (0, j)),   # w2  N tile
                pl.BlockSpec((1, tn), lambda j: (0, j)),     # b2  N tile
            ],
            out_specs=pl.BlockSpec((B, tn), lambda j: (0, j)),
        ),
        compiler_params=pltpu.CompilerParams(
            # >=2 tiles -> both v7x TensorCores stream disjoint w2 tiles.
            dimension_semantics=("parallel",),
        ),
    )(x, w1, b1, w2, b2)

    # Only the zero-padded output columns are dropped (d2p - d2 <= 127).
    return out_p[:, :d2]


# ------------------------------ references -----------------------------------

def decoder_forward_ref(params, x):
    h = jnp.tanh(x @ params["w1"] + params["b1"])
    return h @ params["w2"] + params["b2"]


def decoder_forward_ref_bf16(params, x):
    """Pure-JAX reference emulating the kernel's bf16 weight/activation casts."""
    w1 = params["w1"].astype(jnp.bfloat16)
    w2 = params["w2"].astype(jnp.bfloat16)
    h = jnp.tanh(
        jnp.dot(x.astype(jnp.bfloat16), w1, preferred_element_type=jnp.float32)
        + params["b1"]
    )
    return (
        jnp.dot(h.astype(jnp.bfloat16), w2, preferred_element_type=jnp.float32)
        + params["b2"]
    )


# ---------------------------------- main -------------------------------------

if __name__ == "__main__":
    key = jax.random.PRNGKey(0)
    k_param, k_x = jax.random.split(key)

    # Small shapes consistent with the module (p_dims=[d0, d1, d2], batch B).
    # For real decode traffic, batch the calls (B of 128-512) to amortize the
    # weight stream; the kernel supports any B unchanged.
    p_dims = (200, 600, 2008)
    batch = 4

    params = init_decoder_params(k_param, list(p_dims))
    pparams, tn = pad_decoder_params(params)          # pad + bf16-cast once
    x = jax.random.normal(k_x, (batch, p_dims[0]), jnp.float32)

    fwd = jax.jit(decoder_forward, static_argnums=(2, 3))
    y = fwd(pparams, x, p_dims[2], tn)
    y = jax.block_until_ready(y)

    y_ref_bf16 = decoder_forward_ref_bf16(params, x)  # same-dtype reference
    y_ref_f32 = decoder_forward_ref(params, x)        # full-precision reference

    assert y.shape == (batch, p_dims[2]), y.shape
    assert jnp.allclose(y, y_ref_bf16, atol=1e-3, rtol=1e-3), \
        "mismatch vs bf16 reference"
    assert jnp.allclose(y, y_ref_f32, atol=2e-2, rtol=2e-2), \
        "mismatch vs f32 reference"

    print("KERNEL_OK")
</pallas_src>

<mosaic_0001>
module attributes {stable_mosaic.version = 11 : i64} {
  func.func @_decoder_fused_kernel(%arg0: i32, %arg1: memref<4x200xf32, #tpu.memory_space<vmem>>, %arg2: memref<200x640xbf16, #tpu.memory_space<vmem>>, %arg3: memref<1x640xf32, #tpu.memory_space<vmem>>, %arg4: memref<640x1024xbf16, #tpu.memory_space<vmem>>, %arg5: memref<1x1024xf32, #tpu.memory_space<vmem>>, %arg6: memref<4x1024xf32, #tpu.memory_space<vmem>>) attributes {dimension_semantics = [#tpu.dimension_semantics<parallel>], iteration_bounds = array<i64: 2>, scalar_prefetch = 0 : i64, scratch_operands = 0 : i64, tpu.core_type = #tpu.core_type<tc>, window_params = [{pipeline_mode = #tpu.pipeline_mode<synchronous>, transform_indices = @transform_0, window_bounds = array<i64: 4, 200>}, {pipeline_mode = #tpu.pipeline_mode<synchronous>, transform_indices = @transform_1, window_bounds = array<i64: 200, 640>}, {pipeline_mode = #tpu.pipeline_mode<synchronous>, transform_indices = @transform_2, window_bounds = array<i64: 1, 640>}, {transform_indices = @transform_3, window_bounds = array<i64: 640, 1024>}, {transform_indices = @transform_4, window_bounds = array<i64: 1, 1024>}, {transform_indices = @transform_5, window_bounds = array<i64: 4, 1024>}]} {
    %c0 = arith.constant 0 : index
    %c0_0 = arith.constant 0 : index
    %0 = vector.load %arg1[%c0, %c0_0] : memref<4x200xf32, #tpu.memory_space<vmem>>, vector<4x200xf32>
    %1 = arith.truncf %0 : vector<4x200xf32> to vector<4x200xbf16>
    %c0_1 = arith.constant 0 : index
    %c0_2 = arith.constant 0 : index
    %2 = vector.load %arg2[%c0_1, %c0_2] : memref<200x640xbf16, #tpu.memory_space<vmem>>, vector<200x640xbf16>
    %cst = arith.constant dense<0.000000e+00> : vector<4x640xf32>
    %3 = tpu.matmul %1, %2, %cst {dimension_numbers = #tpu.dot_dimension_numbers<[1], [0], [0], [1], [0, 0, 1, 1], [], []>} : vector<4x200xbf16>, vector<200x640xbf16>, vector<4x640xf32> -> vector<4x640xf32>
    %c0_3 = arith.constant 0 : index
    %c0_4 = arith.constant 0 : index
    %4 = vector.load %arg3[%c0_3, %c0_4] : memref<1x640xf32, #tpu.memory_space<vmem>>, vector<1x640xf32>
    %5 = vector.broadcast %4 : vector<1x640xf32> to vector<4x640xf32>
    %6 = arith.addf %3, %5 : vector<4x640xf32>
    %7 = math.tanh %6 : vector<4x640xf32>
    %8 = arith.truncf %7 : vector<4x640xf32> to vector<4x640xbf16>
    %c0_5 = arith.constant 0 : index
    %c0_6 = arith.constant 0 : index
    %9 = vector.load %arg4[%c0_5, %c0_6] : memref<640x1024xbf16, #tpu.memory_space<vmem>>, vector<640x1024xbf16>
    %cst_7 = arith.constant dense<0.000000e+00> : vector<4x1024xf32>
    %10 = tpu.matmul %8, %9, %cst_7 {dimension_numbers = #tpu.dot_dimension_numbers<[1], [0], [0], [1], [0, 0, 1, 1], [], []>} : vector<4x640xbf16>, vector<640x1024xbf16>, vector<4x1024xf32> -> vector<4x1024xf32>
    %c0_8 = arith.constant 0 : index
    %c0_9 = arith.constant 0 : index
    %11 = vector.load %arg5[%c0_8, %c0_9] : memref<1x1024xf32, #tpu.memory_space<vmem>>, vector<1x1024xf32>
    %12 = vector.broadcast %11 : vector<1x1024xf32> to vector<4x1024xf32>
    %13 = arith.addf %10, %12 : vector<4x1024xf32>
    %c0_10 = arith.constant 0 : index
    %c0_11 = arith.constant 0 : index
    %14 = vector.load %arg6[%c0_10, %c0_11] : memref<4x1024xf32, #tpu.memory_space<vmem>>, vector<4x1024xf32>
    tpu.vector_store %arg6[%c0_10, %c0_11], %13 {strides = array<i32>} : memref<4x1024xf32, #tpu.memory_space<vmem>>, vector<4x1024xf32>,
    return
  }
  func.func @transform_0(%arg0: i32) -> (i32, i32) {
    %c0_i32 = arith.constant 0 : i32
    %c0_i32_0 = arith.constant 0 : i32
    %c0_i32_1 = arith.constant 0 : i32
    return %c0_i32, %c0_i32_0 : i32, i32
  }
  func.func @transform_1(%arg0: i32) -> (i32, i32) {
    %c0_i32 = arith.constant 0 : i32
    %c0_i32_0 = arith.constant 0 : i32
    %c0_i32_1 = arith.constant 0 : i32
    return %c0_i32, %c0_i32_0 : i32, i32
  }
  func.func @transform_2(%arg0: i32) -> (i32, i32) {
    %c0_i32 = arith.constant 0 : i32
    %c0_i32_0 = arith.constant 0 : i32
    %c0_i32_1 = arith.constant 0 : i32
    return %c0_i32, %c0_i32_0 : i32, i32
  }
  func.func @transform_3(%arg0: i32) -> (i32, i32) {
    %c0_i32 = arith.constant 0 : i32
    %c0_i32_0 = arith.constant 0 : i32
    return %c0_i32, %arg0 : i32, i32
  }
  func.func @transform_4(%arg0: i32) -> (i32, i32) {
    %c0_i32 = arith.constant 0 : i32
    %c0_i32_0 = arith.constant 0 : i32
    return %c0_i32, %arg0 : i32, i32
  }
  func.func @transform_5(%arg0: i32) -> (i32, i32) {
    %c0_i32 = arith.constant 0 : i32
    %c0_i32_0 = arith.constant 0 : i32
    return %c0_i32, %arg0 : i32, i32
  }
}

</mosaic_0001>

<bundles_post_ra>
// kernel: decoder_forward.1
= control target key start
LH: loop header
LB: loop body
LE: loop exit
PB: predicated region body
PF: predicated region fallthrough
CT: control target
= control target key end

     0   :  { %s5164_s0 = inlined_call_operand.hbm [shape: f32[4,200], index: 0, kind: input, shape index: {}]   ;;  %s5165_s1 = inlined_call_operand.hbm [shape: bf16[200,640], index: 1, kind: input, shape index: {}]   ;;  %s5166_s2 = inlined_call_operand.hbm [shape: f32[1,640], index: 2, kind: input, shape index: {}]   ;;  %s5167_s3 = inlined_call_operand.hbm [shape: bf16[640,2048], index: 3, kind: input, shape index: {}]   ;;  %s5168_s4 = inlined_call_operand.hbm [shape: f32[1,2048], index: 4, kind: input, shape index: {}]   ;;  %s5169_s5 = inlined_call_operand.hbm [shape: f32[4,2048], index: 5, kind: output, shape index: {}]  }
   0x1   :  { %5181 = sst [smem:[#allocation19_spill]] %s5165_s1 }
   0x2   :  { %5182 = sst [smem:[#allocation20_spill]] %s5167_s3 }
   0x3   :  { %10 = vsyncpa [#allocation3], 0 }
   0x4   :  { %11 = vsyncpa [#allocation6], 0 }
   0x5   :  { %12 = vsyncpa [#allocation9], 0 }
   0x6   :  { %14 = vsyncpa [#allocation9 + $0x1], 0 }
   0x7   :  { %15 = vsyncpa [#allocation4], 0 }
   0x8   :  { %17 = vsyncpa [#allocation4 + $0x1], 0  ;;  %s4422_s18 = smov 0   ;;  %s4424_s19 = smov 0  }
   0x9   :  { %s4426_s20 = smov 0   ;;  %s4428_s21 = smov 0  }
   0xa LB: > { %s4443_s22 = sadd.s32 4294967295, %s4378_s21   ;;  %s3517_s23 = sadd.s32 4294967294, %s4378_s21   ;;  %s4378_s21 = sphi %s4428_s21, %s5212_s21   ;;  %s4374_s20 = sphi %s4426_s20, %s5216_s20   ;;  %s4370_s19 = sphi %s4424_s19, %s5215_s19   ;;  %s4366_s18 = sphi %s4422_s18, %s5214_s18  }
   0xb   : > { %s4447_s24 = sadd.s32 1, %s4378_s21   ;;  %s93_s25 = sadd.s32 1, %s4374_s20 }
   0xc   : > { %5183 = sst [smem:[#allocation16_spill]] %s4447_s24  ;;  %s90_s26 = ssub.s32 %s4378_s21, %s4447_s24 }
   0xd   : > { %p100_p0 = scmp.ne.s32.totalorder %s4374_s20, %s4370_s19  ;;  %p91_p1 = scmp.eq.s32.totalorder %s90_s26, 0 }
   0xe   : > { %p101_p2 = scmp.eq.s32.totalorder %s4378_s21, 0  ;;  %p106_p3 = scmp.ne.s32.totalorder %s4370_s19, %s4366_s18 }
   0xf   : > { %p5170_p4 = scmp.eq.s32.totalorder %s4443_s22, 0  ;;  %p156_p7 = scmp.eq.s32.totalorder %s4443_s22, 1 }
  0x10   : > { %s4459_s27 = scalar_select %p91_p1, %s4374_s20, %s93_s25  }
  0x11   : > { %p4461_p5 = por %p101_p2, %p100_p0  ;;  %p4467_p6 = por %p5170_p4, %p106_p3 }
  0x12   : > { %5184 = sst [smem:[#allocation17_spill]] %s4459_s27  ;;  %p162_p8 = scmp.eq.s32.totalorder %s3517_s23, 1 }
  0x13   : > { %s5185_s28 = scalar_select %p4461_p5, 1, 0 }
  0x14   : > { %s5186_s29 = scalar_select %p4467_p6, 1, 0 }
  0x15   : > { %p3518_p9 = scmp.ge.s32.totalorder %s4378_s21, 1  ;;  %p169_p10 = scmp.lt.s32.totalorder %s4378_s21, 3 }
  0x16   : > { %p4474_p11 = por %p156_p7, %p100_p0  ;;  %p4478_p12 = por %p162_p8, %p106_p3 }
  0x17   : > { %p4482_p13 = pnand %p3518_p9, %p169_p10  ;;  %s4380_s8 = smov [#allocation5]  }
  0x18   : > { %s5187_s30 = scalar_select %p4474_p11, 1, 0 }
  0x19   : > { %s5188_s6 = scalar_select %p4478_p12, 1, 0 }
  0x1a   : > { %s5190_s7 = scalar_select %p4482_p13, 1, 0 }
  0x1b   : > { %5189 = sst [smem:[#allocation18_spill]] %s5188_s6  ;;  %p3990_p1 = pneg %p4482_p13 }
  0x1c   : > { %s192_s9 = sshll.u32 %s4380_s8, 4  ;;  %s217_s11 = sand.u32 1, %s4378_s21   ;;  %s193_s9 = int_to_ptr.vmem [resolvable:$true] %s192_s9 }
  0x1d   : > { %p4490_p2 = pnand %p3990_p1, %p5170_p4  ;;  %s5192_s1 = sld [smem:[#allocation19_spill]] }
  0x1f   : > { %s5191_s10 = scalar_select %p4490_p2, 1, 0 }
  0x20   : > { %p4505_p8 = pneg %p4490_p2 }
  0x23   : > { %s4160_s14 = scalar_lea.hbm %s5192_s1, 8000 }
  0x24   : > { %p4161_p7 = scmp.ne.s32.totalorder %s5192_s1, %s4160_s14  ;;  %p4167_p1 = scmp.lt.u32.totalorder %s4160_s14, %s5192_s1 }
  0x26   : > { %p4163_p9 = pnand %p4505_p8, %p4161_p7 }
  0x28   : > { %p4164_p10 = pneg %p4163_p9 }
  0x2a   : > { %p4169_p0 = pnand %p4167_p1, %p4164_p10 }
  0x2c   : > { %4172 = shalt.err (!%p4169_p0)
}
  0x2d   : > { %s4173_s26 = scalar_lea.vmem %s193_s9, 8000  ;;  %p4181_p11 = scmp.lt.s32.totalorder %s193_s9, %s193_s9 }
  0x2e   : > { %p4174_p4 = scmp.ne.s32.totalorder %s193_s9, %s4173_s26  ;;  %p4182_p6 = scmp.lt.s32.totalorder %s4173_s26, %s4173_s26 }
  0x30   : > { %p4176_p3 = pnand %p4174_p4, %p4505_p8  ;;  %p4183_p13 = por %p4182_p6, %p4181_p11 }
  0x32   : > { %p4177_p12 = pneg %p4176_p3 }
  0x34   : > { %p4184_p5 = pnand %p4183_p13, %p4177_p12 }
  0x36   : > { %4187 = shalt.err (!%p4184_p5)
}
  0x37   : > { %s4381_s8 = smov 320   ;;  %s4382_s12 = smov 20  }
  0x38   : > { %3996 = dma.hbm_to_vmem [thread:$0]  (!%p4490_p2), %s5192_s1, 8000, %s193_s9, [#allocation6], %s4381_s8, %s4381_s8, %s4382_s12  }
  0x39   : > { %p5194_p4 = scmp.ne.s32.totalorder %s5185_s28, 0  ;;  %p5195_p0 = scmp.lt.s32.totalorder %s4378_s21, 2 }
  0x3a   : > { %s5178_s16 = sand.u32 1, %s4374_s20   ;;  %s3929_s25 = sshll.u32 %s4378_s21, 9 }
  0x3b   : > { %p4525_p3 = pnand %p5195_p0, %p5194_p4  ;;  %s3970_s23 = smul.u32 2560, %s5178_s16 }
  0x3c   : > { %s5197_s3 = sld [smem:[#allocation20_spill]]  ;;  %s4540_s8 = scalar_lea.sflag [#allocation9], %s217_s11 }
  0x3d   : > { %s221_s28 = scalar_lea.vmem [#allocation8], %s3970_s23  ;;  %p5180_p6 = pneg %p4525_p3 }
  0x3e   : > { %s228_s9 = sshll.u32 %s221_s28, 4  ;;  %s4538_s9 = int_to_ptr.vmem [resolvable:$true] %s228_s9 }
  0x42   : > { %s4536_s24 = scalar_lea.hbm %s5197_s3, %s3929_s25  ;;  %s4193_s14 = scalar_lea.hbm %s5197_s3, 81920 }
  0x43   : > { %s4188_s12 = scalar_lea.hbm %s4536_s24, 40960  ;;  %p4194_p13 = scmp.lt.u32.totalorder %s4536_s24, %s5197_s3 }
  0x44   : > { %p4189_p5 = scmp.ne.s32.totalorder %s4536_s24, %s4188_s12  ;;  %p4195_p7 = scmp.lt.u32.totalorder %s4193_s14, %s4188_s12 }
  0x45   : > { %p4197_p10 = scmp.lt.u32.totalorder %s4188_s12, %s4536_s24 }
  0x46   : > { %p4191_p11 = pnand %p5180_p6, %p4189_p5  ;;  %p4196_p9 = por %p4195_p7, %p4194_p13 }
  0x48   : > { %p4192_p12 = pneg %p4191_p11  ;;  %p4198_p1 = por %p4197_p10, %p4196_p9 }
  0x4a   : > { %p4199_p4 = pnand %p4198_p1, %p4192_p12 }
  0x4c   : > { %4202 = shalt.err (!%p4199_p4)
}
  0x4d   : > { %s4203_s11 = scalar_lea.vmem %s4538_s9, 40960  ;;  %s4383_s23 = smov [#allocation8]  }
  0x4e   : > { %p4204_p0 = scmp.ne.s32.totalorder %s4538_s9, %s4203_s11  ;;  %s4208_s28 = sshll.u32 %s4383_s23, 4  ;;  %s4209_s28 = int_to_ptr.vmem [resolvable:$false] %s4208_s28 }
  0x4f   : > { %s4210_s27 = scalar_lea.vmem %s4209_s28, 81920  ;;  %p4211_p2 = scmp.lt.s32.totalorder %s4538_s9, %s4209_s28 }
  0x50   : > { %p4206_p5 = pnand %p4204_p0, %p5180_p6  ;;  %p4212_p13 = scmp.lt.s32.totalorder %s4210_s27, %s4203_s11 }
  0x52   : > { %p4207_p11 = pneg %p4206_p5  ;;  %p4213_p7 = por %p4212_p13, %p4211_p2 }
  0x54   : > { %p4214_p9 = pnand %p4213_p7, %p4207_p11 }
  0x56   : > { %4217 = shalt.err (!%p4214_p9)
}
  0x57   : > { %s4384_s12 = smov 1024   ;;  %s4385_s13 = smov 512  }
  0x58   : > { %s4386_s14 = smov 32   ;;  %s4387_s25 = smov [#allocation2]  }
  0x59   : > { %4003 = dma.hbm_to_vmem [thread:$0]  (!%p4525_p3), %s4536_s24, 40960, %s4538_s9, %s4540_s8, %s4384_s12, %s4385_s13, %s4386_s14  }
  0x5a   : > { %s182_s26 = sshll.u32 %s4387_s25, 4  ;;  %s4388_s23 = smov [#allocation7]   ;;  %s183_s26 = int_to_ptr.vmem [resolvable:$true] %s182_s26 }
  0x5b   : > { %s206_s16 = sshll.u32 %s4388_s23, 4  ;;  %s4218_s27 = scalar_lea.hbm %s5164_s0, 128  ;;  %s4568_s16 = int_to_ptr.vmem [resolvable:$true] %s206_s16 }
  0x5c   : > { %p4219_p2 = scmp.ne.s32.totalorder %s5164_s0, %s4218_s27  ;;  %p4225_p1 = scmp.lt.u32.totalorder %s4218_s27, %s5164_s0 }
  0x5e   : > { %p4221_p12 = pnand %p4219_p2, %p4505_p8 }
  0x60   : > { %p4222_p10 = pneg %p4221_p12 }
  0x62   : > { %p4227_p4 = pnand %p4225_p1, %p4222_p10 }
  0x64   : > { %4230 = shalt.err (!%p4227_p4)
}
  0x65   : > { %s4231_s9 = scalar_lea.vmem %s183_s26, 128  ;;  %p4239_p13 = scmp.lt.s32.totalorder %s183_s26, %s183_s26 }
  0x66   : > { %p4232_p0 = scmp.ne.s32.totalorder %s183_s26, %s4231_s9  ;;  %p4240_p7 = scmp.lt.s32.totalorder %s4231_s9, %s4231_s9 }
  0x68   : > { %p4234_p5 = pnand %p4232_p0, %p4505_p8  ;;  %p4241_p9 = por %p4240_p7, %p4239_p13 }
  0x6a   : > { %p4235_p11 = pneg %p4234_p5 }
  0x6c   : > { %p4242_p6 = pnand %p4241_p9, %p4235_p11 }
  0x6e   : > { %4245 = shalt.err (!%p4242_p6)
}
  0x6f   : > { %p5198_p2 = scmp.ne.s32.totalorder %s5191_s10, 0  ;;  %s4246_s13 = scalar_lea.hbm %s5166_s2, 80 }
  0x70   : > { %p4247_p12 = scmp.ne.s32.totalorder %s5166_s2, %s4246_s13  ;;  %p4253_p6 = scmp.lt.u32.totalorder %s4246_s13, %s5166_s2 }
  0x71   : > { %3993 = dma.hbm_to_vmem [thread:$0]  (!%p5198_p2), %s5164_s0, 128, %s183_s26, [#allocation3]  }
  0x72   : > { %p4249_p10 = pnand %p4247_p12, %p4505_p8 }
  0x74   : > { %p4250_p1 = pneg %p4249_p10 }
  0x76   : > { %p4255_p4 = pnand %p4253_p6, %p4250_p1 }
  0x78   : > { %4258 = shalt.err (!%p4255_p4)
}
  0x79   : > { %s4259_s26 = scalar_lea.vmem %s4568_s16, 80  ;;  %s4266_s28 = scalar_lea.vmem %s4568_s16, 96 }
  0x7a   : > { %p4260_p0 = scmp.ne.s32.totalorder %s4568_s16, %s4259_s26  ;;  %p4267_p13 = scmp.lt.s32.totalorder %s4568_s16, %s4568_s16 }
  0x7b   : > { %p4268_p7 = scmp.lt.s32.totalorder %s4266_s28, %s4259_s26 }
  0x7c   : > { %p4262_p5 = pnand %p4260_p0, %p4505_p8 }
  0x7d   : > { %p4269_p9 = por %p4268_p7, %p4267_p13 }
  0x7e   : > { %p4263_p11 = pneg %p4262_p5 }
  0x80   : > { %p4270_p12 = pnand %p4269_p9, %p4263_p11 }
  0x82   : > { %4273 = shalt.err (!%p4270_p12)
}
  0x83   : > { %3999 = dma.hbm_to_vmem [thread:$0]  (!%p5198_p2), %s5166_s2, 80, %s4568_s16, [#allocation6]  }
  0x84   : > { %s5199_s17 = sand.u32 1, %s4374_s20   ;;  %s3930_s1 = sshll.u32 %s4378_s21, 7 }
  0x85   : > { %s3525_s9 = sshll.u32 %s5199_s17, 3  ;;  %s4618_s12 = scalar_lea.hbm %s5168_s4, %s3930_s1 }
  0x86   : > { %s242_s10 = scalar_lea.vmem [#allocation10], %s3525_s9  ;;  %s4274_s14 = scalar_lea.hbm %s4618_s12, 128 }
  0x87   : > { %s250_s13 = sshll.u32 %s242_s10, 4  ;;  %p4275_p8 = scmp.ne.s32.totalorder %s4618_s12, %s4274_s14  ;;  %s251_s13 = int_to_ptr.vmem [resolvable:$true] %s250_s13 }
  0x88   : > { %p5200_p10 = pneg %p4525_p3  ;;  %s4279_s23 = scalar_lea.hbm %s5168_s4, 256 }
  0x89   : > { %p4280_p6 = scmp.lt.u32.totalorder %s4618_s12, %s5168_s4  ;;  %p4281_p4 = scmp.lt.u32.totalorder %s4279_s23, %s4274_s14 }
  0x8a   : > { %p4277_p2 = pnand %p4275_p8, %p5200_p10  ;;  %p4283_p5 = scmp.lt.u32.totalorder %s4274_s14, %s4618_s12 }
  0x8b   : > { %p4282_p0 = por %p4281_p4, %p4280_p6 }
  0x8c   : > { %p4278_p1 = pneg %p4277_p2 }
  0x8d   : > { %p4284_p11 = por %p4283_p5, %p4282_p0 }
  0x8f   : > { %p4285_p13 = pnand %p4284_p11, %p4278_p1 }
  0x91   : > { %4288 = shalt.err (!%p4285_p13)
}
  0x92   : > { %s4289_s28 = scalar_lea.vmem %s251_s13, 128  ;;  %p5201_p9 = pmov %p5200_p10 }
  0x93   : > { %p4290_p7 = scmp.ne.s32.totalorder %s251_s13, %s4289_s28  ;;  %s4389_s27 = smov [#allocation10]  }
  0x94   : > { %s4294_s24 = sshll.u32 %s4389_s27, 4  ;;  %s4295_s24 = int_to_ptr.vmem [resolvable:$false] %s4294_s24 }
  0x95   : > { %p4292_p12 = pnand %p4290_p7, %p5201_p9  ;;  %s4296_s17 = scalar_lea.vmem %s4295_s24, 256 }
  0x96   : > { %p4297_p10 = scmp.lt.s32.totalorder %s251_s13, %s4295_s24  ;;  %p4298_p2 = scmp.lt.s32.totalorder %s4296_s17, %s4289_s28 }
  0x97   : > { %p4293_p8 = pneg %p4292_p12 }
  0x98   : > { %p4299_p4 = por %p4298_p2, %p4297_p10 }
  0x9a   : > { %p4300_p6 = pnand %p4299_p4, %p4293_p8 }
  0x9c   : > { %4303 = shalt.err (!%p4300_p6)
}
  0x9d   : > { %4006 = dma.hbm_to_vmem [thread:$0]  (!%p4525_p3), %s4618_s12, 128, %s251_s13, %s4540_s8  }
  0x9e   : > { %p5202_p1 = scmp.ne.s32.totalorder %s5190_s7, 0 }
  0x9f   : > { %p5203_p0 = scmp.eq.s32.totalorder (!%p5202_p1), %s4443_s22, 0 }
  0xa0   : > { %259 = sbr.rel (%p5202_p1) target bundleno = 977 (0x3d1), region = 40 }
  0xa7   : > { %4349 = dma.done.wait (%p5203_p0), [#allocation3], 128   ;;  %p5204_p5 = pmov %p5203_p0 }
  0xa8   : > { %p5205_p11 = pmov %p5203_p0 }
  0xa9   : > { %4351 = vsyncadd (%p5204_p5), [#allocation3], 4294967168 }
  0xaa   : > { %4353 = dma.done.wait (%p5205_p11), [#allocation6], 8080   ;;  %p5206_p13 = pmov %p5203_p0 }
  0xab   : > { %s273_s15 = sand.u32 1, %s4443_s22   ;;  %s4652_s8 = sand.u32 1, %s4370_s19  }
  0xac   : > { %4355 = vsyncadd (%p5206_p13), [#allocation6], 4294959216  ;;  %s3971_s7 = smul.u32 2560, %s4652_s8  ;;  %s274_s9 = scalar_lea.sflag [#allocation9], %s273_s15 }
  0xad   : > { %p5207_p3 = scmp.ne.s32.totalorder %s5186_s29, 0 }
  0xae   : > { %s4655_s1 = scalar_lea.vmem [#allocation8], %s3971_s7 }
  0xaf   : > { %4357 = dma.done.wait (%p5207_p3), %s274_s9, 41088  }
  0xb0   : > { %4359 = vsyncadd (%p5207_p3), %s274_s9, 4294926208  ;;  %v4060_v0 = vld [vmem:[#allocation5 + $0x4] ss:$20 sps:$4 sm:$0xff]   ;;  %v4062_v1 = vld [vmem:[#allocation5] ss:$20 sps:$4 sm:$0xff]   ;;  %vm755_vm0 = vcmask 588800  }
  0xb1   : > { %775 = vmatprep.subr.bf16.mxu0 %v4060_v0  ;;  %v4063_v2 = vld [vmem:[#allocation5 + $0x2c] ss:$20 sps:$4 sm:$0xff]   ;;  %v4065_v3 = vld [vmem:[#allocation5 + $0x28] ss:$20 sps:$4 sm:$0xff]   ;;  %v4068_v5 = vld [vmem:[#allocation5 + $0x50] ss:$20 sps:$4 sm:$0xff]  }
  0xb2   : > { %776 = vmatpush1.bf16.msra.mxu0 %v4062_v1  ;;  %v4066_v4 = vld [vmem:[#allocation5 + $0x54] ss:$20 sps:$4 sm:$0xff]   ;;  %v4069_v6 = vld [vmem:[#allocation5 + $0x7c] ss:$20 sps:$4 sm:$0xff]   ;;  %v4071_v7 = vld [vmem:[#allocation5 + $0x78] ss:$20 sps:$4 sm:$0xff]  }
  0xb3   : > { %777 = vmatprep.subr.bf16.mxu0 %v4063_v2  ;;  %v4072_v8 = vld [vmem:[#allocation5 + $0xa4] ss:$20 sps:$4 sm:$0xff]   ;;  %v4074_v9 = vld [vmem:[#allocation5 + $0xa0] ss:$20 sps:$4 sm:$0xff]   ;;  %v4101_v14 = vld [vmem:[#allocation5 + $0x8] ss:$20 sps:$4 sm:$0xff]  }
  0xb4   : > { %v4075_v10 = vld [vmem:[#allocation5 + $0xcc] ss:$20 sps:$4 sm:$0xff]   ;;  %v4661_v11 = vld [vmem:[#allocation2] sm:$0xff]  ;;  %v4102_v15 = vld [vmem:[#allocation5 + $0x34] ss:$20 sps:$4 sm:$0xff]   ;;  %vm759_vm1 = vcmask 1043456  }
  0xb5   : > { %v324_v12 = vcombine.high %v4661_v11, %v4661_v11  ;;  %v4099_v13 = vld [vmem:[#allocation5 + $0xc] ss:$20 sps:$4 sm:$0xff]   ;;  %v4077_v16 = vld [vmem:[#allocation5 + $0xc8] ss:$20 sps:$4 sm:$0xff]   ;;  %v4104_v19 = vld [vmem:[#allocation5 + $0x30] ss:$20 sps:$4 sm:$0xff]   ;;  %v4675_v50 = vpack.c.bf16 %v4661_v11, %v4661_v11 }
  0xb6   : > { %778 = vmatpush1.bf16.msra.mxu0 %v4065_v3  ;;  %816 = vmatprep.subr.bf16.mxu1 %v4099_v13  ;;  %v4078_v18 = vld [vmem:[#allocation5 + $0xf4] ss:$20 sps:$4 sm:$0xff]   ;;  %v4105_v20 = vld [vmem:[#allocation5 + $0x5c] ss:$20 sps:$4 sm:$0xff]   ;;  %v4107_v23 = vld [vmem:[#allocation5 + $0x58] ss:$20 sps:$4 sm:$0xff]  }
  0xb7   : > { %779 = vmatprep.subr.bf16.mxu0 %v4066_v4  ;;  %v4665_v17 = vpack.c.bf16 %v324_v12, %v324_v12  ;;  %817 = vmatpush1.bf16.msra.mxu1 %v4101_v14  ;;  %v4080_v21 = vld [vmem:[#allocation5 + $0xf0] ss:$20 sps:$4 sm:$0xff]   ;;  %v4083_v25 = vld [vmem:[#allocation5 + $0x118] ss:$20 sps:$4 sm:$0xff]   ;;  %v4110_v27 = vld [vmem:[#allocation5 + $0x80] ss:$20 sps:$4 sm:$0xff]  }
  0xb8   : > { %818 = vmatprep.subr.bf16.mxu1 %v4102_v15  ;;  %v4081_v22 = vld [vmem:[#allocation5 + $0x11c] ss:$20 sps:$4 sm:$0xff]   ;;  %v4108_v24 = vld [vmem:[#allocation5 + $0x84] ss:$20 sps:$4 sm:$0xff]   ;;  %v4111_v28 = vld [vmem:[#allocation5 + $0xac] ss:$20 sps:$4 sm:$0xff]  }
  0xb9   : > { %3600 = vmatprep.mubr.msk.bf16.mxu0 %vm755_vm0, %v4665_v17  ;;  %3602 = vmatprep.mubr.msk.bf16.mxu1 %vm755_vm0, %v4665_v17  ;;  %v4084_v26 = vld [vmem:[#allocation5 + $0x144] ss:$20 sps:$4 sm:$0xff]   ;;  %v4086_v29 = vld [vmem:[#allocation5 + $0x140] ss:$20 sps:$4 sm:$0xff]   ;;  %v4113_v31 = vld [vmem:[#allocation5 + $0xa8] ss:$20 sps:$4 sm:$0xff]  }
  0xba   : > { %780 = vmatpush1.bf16.msra.mxu0 %v4068_v5  ;;  %v4087_v30 = vld [vmem:[#allocation5 + $0x16c] ss:$20 sps:$4 sm:$0xff]   ;;  %v4114_v32 = vld [vmem:[#allocation5 + $0xd4] ss:$20 sps:$4 sm:$0xff]   ;;  %v4116_v35 = vld [vmem:[#allocation5 + $0xd0] ss:$20 sps:$4 sm:$0xff]  }
  0xbb   : > { %781 = vmatprep.subr.bf16.mxu0 %v4069_v6  ;;  %819 = vmatpush1.bf16.msra.mxu1 %v4104_v19  ;;  %v4089_v33 = vld [vmem:[#allocation5 + $0x168] ss:$20 sps:$4 sm:$0xff]   ;;  %v4092_v36 = vld [vmem:[#allocation5 + $0x190] ss:$20 sps:$4 sm:$0xff]   ;;  %v4119_v40 = vld [vmem:[#allocation5 + $0xf8] ss:$20 sps:$4 sm:$0xff]  }
  0xbc   : > { %820 = vmatprep.subr.bf16.mxu1 %v4105_v20  ;;  %v4090_v34 = vld [vmem:[#allocation5 + $0x194] ss:$20 sps:$4 sm:$0xff]   ;;  %v4117_v37 = vld [vmem:[#allocation5 + $0xfc] ss:$20 sps:$4 sm:$0xff]   ;;  %v400_v39 = vld [vmem:[#allocation5 + $0x1e0] sm:$0xff]  ;;  %v4390_v52 = vmov 0  }
  0xbd   : > { %v4093_v38 = vld [vmem:[#allocation5 + $0x1bc] ss:$20 sps:$4 sm:$0xff]   ;;  %v4120_v41 = vld [vmem:[#allocation5 + $0x124] ss:$20 sps:$4 sm:$0xff]   ;;  %v3595_v43 = vcombine.high %v400_v39, %v400_v39  ;;  %v3594_v44 = vcombine.low %v400_v39, %v400_v39  ;;  %v4122_v45 = vld [vmem:[#allocation5 + $0x120] ss:$20 sps:$4 sm:$0xff]  }
  0xbe   : > { %782 = vmatpush1.bf16.msra.mxu0 %v4071_v7  ;;  %v4095_v42 = vld [vmem:[#allocation5 + $0x1b8] ss:$20 sps:$4 sm:$0xff]   ;;  %v4125_v48 = vld [vmem:[#allocation5 + $0x148] ss:$20 sps:$4 sm:$0xff]   ;;  %v4126_v51 = vld [vmem:[#allocation5 + $0x10] ss:$20 sps:$4 sm:$0xff]  }
  0xbf   : > { %783 = vmatprep.subr.bf16.mxu0 %v4072_v8  ;;  %821 = vmatpush1.bf16.msra.mxu1 %v4107_v23  ;;  %v4123_v46 = vld [vmem:[#allocation5 + $0x14c] ss:$20 sps:$4 sm:$0xff]   ;;  %v761_v47 = vsel %vm759_vm1, %v3594_v44, 0  ;;  %v4127_v49 = vld [vmem:[#allocation5 + $0x174] ss:$20 sps:$4 sm:$0xff]   ;;  %s3532_s29 = sshll.u32 %s4652_s8, 3 }
  0xc0   : > { %822 = vmatprep.subr.bf16.mxu1 %v4108_v24  ;;  %v4129_v53 = vld [vmem:[#allocation5 + $0x170] ss:$20 sps:$4 sm:$0xff]   ;;  %v4130_v55 = vld [vmem:[#allocation5 + $0x38] ss:$20 sps:$4 sm:$0xff]   ;;  %v4134_v59 = vld [vmem:[#allocation5 + $0x60] ss:$20 sps:$4 sm:$0xff]  }
  0xc1   : > { %v4131_v54 = vld [vmem:[#allocation5 + $0x19c] ss:$20 sps:$4 sm:$0xff]   ;;  %v4133_v56 = vld [vmem:[#allocation5 + $0x198] ss:$20 sps:$4 sm:$0xff]   ;;  %v4137_v60 = vld [vmem:[#allocation5 + $0x1c0] ss:$20 sps:$4 sm:$0xff]  }
  0xc2   : > { %784 = vmatpush1.bf16.msra.mxu0 %v4074_v9  ;;  %v4135_v57 = vld [vmem:[#allocation5 + $0x1c4] ss:$20 sps:$4 sm:$0xff]   ;;  %v401_v58 = vld [vmem:[#allocation5 + $0x1e8] sm:$0xff]  ;;  %s286_s3 = scalar_lea.vmem [#allocation10], %s3532_s29  ;;  %s3533_s6 = sshll.u32 %s4652_s8, 5 }
  0xc3   : > { %785 = vmatprep.subr.bf16.mxu0 %v4075_v10  ;;  %823 = vmatpush1.bf16.msra.mxu1 %v4110_v27  ;;  %v3597_v61 = vcombine.high %v401_v58, %v401_v58  ;;  %v3596_v62 = vcombine.low %v401_v58, %v401_v58  ;;  %v907_v63 = vld [vmem:[%s4655_s1] sm:$0xff]  ;;  %v4141_v6 = vld [vmem:[#allocation5 + $0xb0] ss:$20 sps:$4 sm:$0xff]   ;;  %s5100_s12 = scalar_lea.vmem [#allocation11], %s3533_s6  ;;  %s3931_s10 = sshll.u32 %s4443_s22, 9 }
  0xc4   : > { %824 = vmatprep.subr.bf16.mxu1 %v4111_v28  ;;  %v911_v0 = vld [vmem:[%s4655_s1 + $0x20] sm:$0xff]  ;;  %v908_v44 = vld [vmem:[%s4655_s1 + $0x8] sm:$0xff]  ;;  %s3396_s13 = sshll.u32 %s5100_s12, 4  ;;  %s5119_s25 = scalar_lea.hbm %s5169_s5, %s3931_s10  ;;  %s5121_s13 = int_to_ptr.vmem [resolvable:$true] %s3396_s13 }
  0xc5   : > { %v4138_v1 = vld [vmem:[#allocation5 + $0x88] ss:$20 sps:$4 sm:$0xff]   ;;  %v767_v2 = vsel %vm759_vm1, %v3596_v62, 0  ;;  %v3605_v3 = vcombine.high %v907_v63, %v911_v0  ;;  %v3604_v7 = vcombine.low %v907_v63, %v911_v0  ;;  %v4142_v11 = vld [vmem:[#allocation5 + $0xd8] ss:$20 sps:$4 sm:$0xff]   ;;  %s3382_s23 = scalar_lea.sflag [#allocation4], %s4652_s8 }
  0xc6   : > { %786 = vmatpush1.bf16.msra.mxu0 %v4077_v16  ;;  %v915_v4 = vld [vmem:[%s4655_s1 + $0x40] sm:$0xff]  ;;  %v924_v62 = vld [vmem:[%s4655_s1 + $0x88] sm:$0xff]  ;;  %s4304_s11 = scalar_lea.vmem %s5121_s13, 512  ;;  %p5208_p9 = scmp.ne.s32.totalorder %s5187_s30, 0 }
  0xc7   : > { %787 = vmatprep.subr.bf16.mxu0 %v4078_v18  ;;  %825 = vmatpush1.bf16.msra.mxu1 %v4113_v31  ;;  %v919_v5 = vld [vmem:[%s4655_s1 + $0x60] sm:$0xff]  ;;  %v928_v63 = vld [vmem:[%s4655_s1 + $0xa8] sm:$0xff]  ;;  %p4305_p7 = scmp.ne.s32.totalorder %s5121_s13, %s4304_s11  ;;  %s4391_s22 = smov [#allocation11]  }
  0xc8   : > { %826 = vmatprep.subr.bf16.mxu1 %v4114_v32  ;;  %v3613_v8 = vcombine.high %v915_v4, %v919_v5  ;;  %v923_v9 = vld [vmem:[%s4655_s1 + $0x80] sm:$0xff]  ;;  %v3612_v12 = vcombine.low %v915_v4, %v919_v5  ;;  %v3623_v4 = vcombine.high %v924_v62, %v928_v63  ;;  %s4308_s26 = sshll.u32 %s4391_s22, 4  ;;  %s4309_s26 = int_to_ptr.vmem [resolvable:$false] %s4308_s26 }
  0xc9   : > { %v927_v10 = vld [vmem:[%s4655_s1 + $0xa0] sm:$0xff]  ;;  %p4306_p12 = pnand %p4305_p7, %p5208_p9  ;;  %s4310_s28 = scalar_lea.vmem %s4309_s26, 1024 }
  0xca   : > { %788 = vmatpush1.bf16.msra.mxu0 %v4080_v21  ;;  %v3621_v13 = vcombine.high %v923_v9, %v927_v10  ;;  %v931_v14 = vld [vmem:[%s4655_s1 + $0xc0] sm:$0xff]  ;;  %p4311_p10 = scmp.lt.s32.totalorder %s5121_s13, %s4309_s26  ;;  %p4312_p2 = scmp.lt.s32.totalorder %s4310_s28, %s4304_s11 }
  0xcb   : > { %789 = vmatprep.subr.bf16.mxu0 %v4081_v22  ;;  %827 = vmatpush1.bf16.msra.mxu1 %v4116_v35  ;;  %v935_v15 = vld [vmem:[%s4655_s1 + $0xe0] sm:$0xff]  ;;  %p4307_p8 = pneg %p4306_p12 }
  0xcc   : > { %828 = vmatprep.subr.bf16.mxu1 %v4117_v37  ;;  %v4143_v16 = vld [vmem:[#allocation5 + $0x100] ss:$20 sps:$4 sm:$0xff]   ;;  %v3629_v18 = vcombine.high %v931_v14, %v935_v15  ;;  %v4144_v21 = vld [vmem:[#allocation5 + $0x128] ss:$20 sps:$4 sm:$0xff]   ;;  %v3628_v22 = vcombine.low %v931_v14, %v935_v15  ;;  %v4146_v31 = vld [vmem:[#allocation5 + $0x178] ss:$20 sps:$4 sm:$0xff]   ;;  %p4313_p4 = por %p4312_p2, %p4311_p10 }
  0xcd   : > { %v939_v19 = vld [vmem:[%s4655_s1 + $0x100] sm:$0xff]  ;;  %v948_v15 = vld [vmem:[%s4655_s1 + $0x148] sm:$0xff] }
  0xce   : > { %790 = vmatpush1.bf16.msra.mxu0 %v4083_v25  ;;  %v943_v20 = vld [vmem:[%s4655_s1 + $0x120] sm:$0xff]  ;;  %p4314_p6 = pnand %p4313_p4, %p4307_p8 }
  0xcf   : > { %791 = vmatprep.subr.bf16.mxu0 %v4084_v26  ;;  %829 = vmatpush1.bf16.msra.mxu1 %v4119_v40  ;;  %v3637_v23 = vcombine.high %v939_v19, %v943_v20  ;;  %v947_v24 = vld [vmem:[%s4655_s1 + $0x140] sm:$0xff]  ;;  %v4145_v26 = vld [vmem:[#allocation5 + $0x150] ss:$20 sps:$4 sm:$0xff]   ;;  %v3636_v27 = vcombine.low %v939_v19, %v943_v20 }
  0xd0   : > { %830 = vmatprep.subr.bf16.mxu1 %v4120_v41  ;;  %v951_v25 = vld [vmem:[%s4655_s1 + $0x160] sm:$0xff]  ;;  %v956_v19 = vld [vmem:[%s4655_s1 + $0x188] sm:$0xff] }
  0xd1   : > { %v3645_v28 = vcombine.high %v947_v24, %v951_v25  ;;  %v3644_v32 = vcombine.low %v947_v24, %v951_v25  ;;  %v967_v35 = vld [vmem:[%s4655_s1 + $0x1e0] sm:$0xff]  ;;  %v960_v20 = vld [vmem:[%s4655_s1 + $0x1a8] sm:$0xff] }
  0xd2   : > { %792 = vmatpush1.bf16.msra.mxu0 %v4086_v29  ;;  %v955_v29 = vld [vmem:[%s4655_s1 + $0x180] sm:$0xff]  ;;  %v968_v24 = vld [vmem:[%s4655_s1 + $0x1e8] sm:$0xff]  ;;  %v3654_v25 = vcombine.low %v956_v19, %v960_v20 }
  0xd3   : > { %793 = vmatprep.subr.bf16.mxu0 %v4087_v30  ;;  %831 = vmatpush1.bf16.msra.mxu1 %v4122_v45  ;;  %v959_v30 = vld [vmem:[%s4655_s1 + $0x1a0] sm:$0xff]  ;;  %v912_v45 = vld [vmem:[%s4655_s1 + $0x28] sm:$0xff] }
  0xd4   : > { %832 = vmatprep.subr.bf16.mxu1 %v4123_v46  ;;  %v3652_v37 = vcombine.low %v955_v29, %v959_v30  ;;  %v971_v39 = vld [vmem:[%s4655_s1 + $0x200] sm:$0xff] }
  0xd5   : > { %v975_v40 = vld [vmem:[%s4655_s1 + $0x220] sm:$0xff] }
  0xd6   : > { %794 = vmatpush1.bf16.msra.mxu0 %v4089_v33  ;;  %v3653_v33 = vcombine.high %v955_v29, %v959_v30  ;;  %v4148_v41 = vld [vmem:[#allocation5 + $0x1c8] ss:$20 sps:$4 sm:$0xff]   ;;  %v3669_v46 = vcombine.high %v971_v39, %v975_v40 }
  0xd7   : > { %795 = vmatprep.subr.bf16.mxu0 %v4090_v34  ;;  %833 = vmatpush1.bf16.msra.mxu1 %v4125_v48  ;;  %v963_v34 = vld [vmem:[%s4655_s1 + $0x1c0] sm:$0xff] }
  0xd8   : > { %834 = vmatprep.subr.bf16.mxu1 %v4127_v49  ;;  %v983_v48 = vld [vmem:[%s4655_s1 + $0x260] sm:$0xff] }
  0xd9   : > { %v991_v58 = vld [vmem:[%s4655_s1 + $0x2a0] sm:$0xff] }
  0xda   : > { %796 = vmatpush1.bf16.msra.mxu0 %v4092_v36  ;;  %v4147_v36 = vld [vmem:[#allocation5 + $0x1a0] ss:$20 sps:$4 sm:$0xff]  }
  0xdb   : > { %797 = vmatprep.subr.bf16.mxu0 %v4093_v38  ;;  %835 = vmatpush1.bf16.msra.mxu1 %v4129_v53  ;;  %v3661_v38 = vcombine.high %v963_v34, %v967_v35  ;;  %v3668_v53 = vcombine.low %v971_v39, %v975_v40  ;;  %v992_v39 = vld [vmem:[%s4655_s1 + $0x2a8] sm:$0xff] }
  0xdc   : > { %836 = vmatprep.subr.bf16.mxu1 %v4131_v54  ;;  %v916_v54 = vld [vmem:[%s4655_s1 + $0x48] sm:$0xff] }
  0xde   : > { %798 = vmatpush1.bf16.msra.mxu0 %v4095_v42  ;;  %v4149_v42 = vld [vmem:[#allocation5 + $0x1f0] ss:$0 sps:$4 sm:$0xff]  }
  0xdf   : > { %3599 = vmatprep.subr.msk.bf16.mxu0 %vm759_vm1, %v3595_v43  ;;  %837 = vmatpush1.bf16.msra.mxu1 %v4133_v56  ;;  %v3660_v43 = vcombine.low %v963_v34, %v967_v35  ;;  %v773_v49 = vsel %vm759_vm1, %v4149_v42, 0  ;;  %v1003_v34 = vld [vmem:[%s4655_s1 + $0x300] sm:$0xff] }
  0xe0   : > { %838 = vmatprep.subr.bf16.mxu1 %v4135_v57  ;;  %v987_v57 = vld [vmem:[%s4655_s1 + $0x280] sm:$0xff] }
  0xe1   : > { %v3685_v0 = vcombine.high %v987_v57, %v991_v58  ;;  %v3684_v5 = vcombine.low %v987_v57, %v991_v58  ;;  %v1007_v35 = vld [vmem:[%s4655_s1 + $0x320] sm:$0xff]  ;;  %v1008_v57 = vld [vmem:[%s4655_s1 + $0x328] sm:$0xff] }
  0xe2   : > { %800 = vmatpush1.bf16.msra.mxu0 %v761_v47  ;;  %v979_v47 = vld [vmem:[%s4655_s1 + $0x240] sm:$0xff]  ;;  %v3700_v40 = vcombine.low %v1003_v34, %v1007_v35 }
  0xe3   : > { %857 = vmatprep.subr.bf16.mxu0 %v4390_v52  ;;  %839 = vmatpush1.bf16.msra.mxu1 %v4137_v60  ;;  %v3677_v56 = vcombine.high %v979_v47, %v983_v48  ;;  %v1011_v42 = vld [vmem:[%s4655_s1 + $0x340] sm:$0xff] }
  0xe4   : > { %3601 = vmatprep.subr.msk.bf16.mxu1 %vm759_vm1, %v3597_v61  ;;  %v3676_v61 = vcombine.low %v979_v47, %v983_v48  ;;  %v1000_v47 = vld [vmem:[%s4655_s1 + $0x2e8] sm:$0xff] }
  0xe5   : > { %808 = vmatmul.mubr.bf16.vlgmr.msra.gmra.mrb[0].mxu0 %v4675_v50 }
  0xe6   : > { %858 = vmatpush1.bf16.msra.mxu0 %v4126_v51  ;;  %3603 = vmatprep.mubr.msk.bf16.mxu0 %vm755_vm0, %v4665_v17  ;;  %v3620_v17 = vcombine.low %v923_v9, %v927_v10  ;;  %v3607_v51 = vcombine.high %v908_v44, %v912_v45  ;;  %v3622_v9 = vcombine.low %v924_v62, %v928_v63 }
  0xe7   : > { %859 = vmatprep.subr.bf16.mxu0 %v4390_v52  ;;  %841 = vmatpush1.bf16.msra.mxu1 %v767_v2  ;;  %v999_v2 = vld [vmem:[%s4655_s1 + $0x2e0] sm:$0xff] }
  0xe8   : > { %2869 = vmatprep.subr.bf16.mxu1 %v3605_v3 }
  0xea   : > { %860 = vmatpush1.bf16.msra.mxu0 %v4130_v55  ;;  %849 = vmatmul.mubr.bf16.vlgmr.msra.gmra.mrb[0].mxu1 %v4675_v50  ;;  %v920_v55 = vld [vmem:[%s4655_s1 + $0x68] sm:$0xff] }
  0xeb   : > { %861 = vmatprep.subr.bf16.mxu0 %v4390_v52  ;;  %2870 = vmatpush1.bf16.msra.mxu1 %v3604_v7  ;;  %v3615_v60 = vcombine.high %v916_v54, %v920_v55  ;;  %v3614_v3 = vcombine.low %v916_v54, %v920_v55  ;;  %v936_v7 = vld [vmem:[%s4655_s1 + $0xe8] sm:$0xff] }
  0xec   : > { %2871 = vmatprep.subr.bf16.mxu1 %v3613_v8 }
  0xee   : > { %862 = vmatpush1.bf16.msra.mxu0 %v4134_v59  ;;  %v3606_v59 = vcombine.low %v908_v44, %v912_v45 }
  0xef   : > { %863 = vmatprep.subr.bf16.mxu0 %v4390_v52  ;;  %2872 = vmatpush1.bf16.msra.mxu1 %v3612_v12  ;;  %v944_v12 = vld [vmem:[%s4655_s1 + $0x128] sm:$0xff] }
  0xf0   : > { %2873 = vmatprep.subr.bf16.mxu1 %v3621_v13 }
  0xf2   : > { %864 = vmatpush1.bf16.msra.mxu0 %v4138_v1  ;;  %v995_v1 = vld [vmem:[%s4655_s1 + $0x2c0] sm:$0xff] }
  0xf3   : > { %865 = vmatprep.subr.bf16.mxu0 %v4390_v52  ;;  %2874 = vmatpush1.bf16.msra.mxu1 %v3620_v17  ;;  %v3693_v8 = vcombine.high %v995_v1, %v999_v2  ;;  %v3692_v10 = vcombine.low %v995_v1, %v999_v2  ;;  %v1016_v1 = vld [vmem:[%s4655_s1 + $0x368] sm:$0xff] }
  0xf4   : > { %2875 = vmatprep.subr.bf16.mxu1 %v3629_v18 }
  0xf6   : > { %866 = vmatpush1.bf16.msra.mxu0 %v4141_v6  ;;  %v932_v6 = vld [vmem:[%s4655_s1 + $0xc8] sm:$0xff] }
  0xf7   : > { %867 = vmatprep.subr.bf16.mxu0 %v4390_v52  ;;  %2876 = vmatpush1.bf16.msra.mxu1 %v3628_v22  ;;  %v3630_v13 = vcombine.low %v932_v6, %v936_v7  ;;  %v3655_v22 = vcombine.high %v956_v19, %v960_v20 }
  0xf8   : > { %2877 = vmatprep.subr.bf16.mxu1 %v3637_v23  ;;  %v964_v23 = vld [vmem:[%s4655_s1 + $0x1c8] sm:$0xff] }
  0xf9   : > { %v3662_v29 = vcombine.low %v964_v23, %v968_v24 }
  0xfa   : > { %868 = vmatpush1.bf16.msra.mxu0 %v4142_v11  ;;  %v940_v11 = vld [vmem:[%s4655_s1 + $0x108] sm:$0xff] }
  0xfb   : > { %869 = vmatprep.subr.bf16.mxu0 %v4390_v52  ;;  %2878 = vmatpush1.bf16.msra.mxu1 %v3636_v27  ;;  %v3639_v14 = vcombine.high %v940_v11, %v944_v12  ;;  %v3638_v17 = vcombine.low %v940_v11, %v944_v12  ;;  %v972_v27 = vld [vmem:[%s4655_s1 + $0x208] sm:$0xff] }
  0xfc   : > { %2879 = vmatprep.subr.bf16.mxu1 %v3645_v28  ;;  %v976_v28 = vld [vmem:[%s4655_s1 + $0x228] sm:$0xff] }
  0xfd   : > { %v3671_v30 = vcombine.high %v972_v27, %v976_v28 }
  0xfe   : > { %870 = vmatpush1.bf16.msra.mxu0 %v4143_v16  ;;  %v952_v16 = vld [vmem:[%s4655_s1 + $0x168] sm:$0xff] }
  0xff   : > { %871 = vmatprep.subr.bf16.mxu0 %v4390_v52  ;;  %2880 = vmatpush1.bf16.msra.mxu1 %v3644_v32  ;;  %v3647_v18 = vcombine.high %v948_v15, %v952_v16  ;;  %v984_v32 = vld [vmem:[%s4655_s1 + $0x268] sm:$0xff] }
 0x100   : > { %2881 = vmatprep.subr.bf16.mxu1 %v3653_v33  ;;  %v3670_v33 = vcombine.low %v972_v27, %v976_v28 }
 0x102   : > { %872 = vmatpush1.bf16.msra.mxu0 %v4144_v21  ;;  %v3646_v21 = vcombine.low %v948_v15, %v952_v16  ;;  %v1028_v15 = vld [vmem:[%s4655_s1 + $0x3c8] sm:$0xff] }
 0x103   : > { %873 = vmatprep.subr.bf16.mxu0 %v4390_v52  ;;  %2882 = vmatpush1.bf16.msra.mxu1 %v3652_v37  ;;  %v3701_v37 = vcombine.high %v1003_v34, %v1007_v35  ;;  %v1032_v16 = vld [vmem:[%s4655_s1 + $0x3e8] sm:$0xff]  ;;  %v1043_v35 = vld [vmem:[%s4655_s1 + $0x440] sm:$0xff] }
 0x104   : > { %2883 = vmatprep.subr.bf16.mxu1 %v3661_v38  ;;  %v988_v38 = vld [vmem:[%s4655_s1 + $0x288] sm:$0xff]  ;;  %v3726_v19 = vcombine.low %v1028_v15, %v1032_v16 }
 0x105   : > { %v3687_v44 = vcombine.high %v988_v38, %v992_v39 }
 0x106   : > { %874 = vmatpush1.bf16.msra.mxu0 %v4145_v26  ;;  %v3663_v26 = vcombine.high %v964_v23, %v968_v24  ;;  %v4781_v24 = vld [vmem:[#allocation7] sm:$0x1f] }
 0x107   : > { %875 = vmatprep.subr.bf16.mxu0 %v4390_v52  ;;  %2884 = vmatpush1.bf16.msra.mxu1 %v3660_v43  ;;  %v1015_v43 = vld [vmem:[%s4655_s1 + $0x360] sm:$0xff] }
 0x108   : > { %2885 = vmatprep.subr.bf16.mxu1 %v3669_v46  ;;  %v3709_v45 = vcombine.high %v1011_v42, %v1015_v43  ;;  %v996_v46 = vld [vmem:[%s4655_s1 + $0x2c8] sm:$0xff]  ;;  %v3708_v48 = vcombine.low %v1011_v42, %v1015_v43 }
 0x109   : > { %v3695_v54 = vcombine.high %v996_v46, %v1000_v47 }
 0x10a   : > { %876 = vmatpush1.bf16.msra.mxu0 %v4146_v31  ;;  %v980_v31 = vld [vmem:[%s4655_s1 + $0x248] sm:$0xff] }
 0x10b   : > { %877 = vmatprep.subr.bf16.mxu0 %v4390_v52  ;;  %2886 = vmatpush1.bf16.msra.mxu1 %v3668_v53  ;;  %v1023_v53 = vld [vmem:[%s4655_s1 + $0x3a0] sm:$0xff] }
 0x10c   : > { %2887 = vmatprep.subr.bf16.mxu1 %v3677_v56  ;;  %v1004_v56 = vld [vmem:[%s4655_s1 + $0x308] sm:$0xff] }
 0x10d   : > { %v3703_v62 = vcombine.high %v1004_v56, %v1008_v57 }
 0x10e   : > { %878 = vmatpush1.bf16.msra.mxu0 %v4147_v36  ;;  %v3679_v36 = vcombine.high %v980_v31, %v984_v32 }
 0x10f   : > { %879 = vmatprep.subr.bf16.mxu0 %v4390_v52  ;;  %2888 = vmatpush1.bf16.msra.mxu1 %v3676_v61  ;;  %v1031_v61 = vld [vmem:[%s4655_s1 + $0x3e0] sm:$0xff] }
 0x110   : > { %2889 = vmatprep.subr.bf16.mxu1 %v3685_v0  ;;  %v1012_v0 = vld [vmem:[%s4655_s1 + $0x348] sm:$0xff] }
 0x112   : > { %880 = vmatpush1.bf16.msra.mxu0 %v4148_v41  ;;  %v3678_v41 = vcombine.low %v980_v31, %v984_v32 }
 0x113   : > { %881 = vmatprep.subr.bf16.mxu0 %v4390_v52  ;;  %2890 = vmatpush1.bf16.msra.mxu1 %v3684_v5  ;;  %v4762_v5 = vld [vmem:[%s4655_s1 + $0x420] sm:$0xff] }
 0x114   : > { %2891 = vmatprep.subr.bf16.mxu1 %v3693_v8 }
 0x116   : > { %882 = vmatpush1.bf16.msra.mxu0 %v773_v49  ;;  %v3686_v49 = vcombine.low %v988_v38, %v992_v39  ;;  %v1044_v38 = vld [vmem:[%s4655_s1 + $0x448] sm:$0xff] }
 0x117   : > { %2992 = vmatprep.subr.bf16.mxu0 %v3607_v51  ;;  %2892 = vmatpush1.bf16.msra.mxu1 %v3692_v10  ;;  %v1019_v51 = vld [vmem:[%s4655_s1 + $0x380] sm:$0xff]  ;;  %v1024_v10 = vld [vmem:[%s4655_s1 + $0x3a8] sm:$0xff] }
 0x118   : > { %2893 = vmatprep.subr.bf16.mxu1 %v3701_v37  ;;  %v3717_v55 = vcombine.high %v1019_v51, %v1023_v53  ;;  %v3716_v58 = vcombine.low %v1019_v51, %v1023_v53  ;;  %v1047_v37 = vld [vmem:[%s4655_s1 + $0x460] sm:$0xff]  ;;  %v1048_v39 = vld [vmem:[%s4655_s1 + $0x468] sm:$0xff] }
 0x119   : > { %890 = vmatmul.mubr.bf16.vlgmr.msra.gmra.mrb[4].mxu0 %v4675_v50  ;;  %v3631_v50 = vcombine.high %v932_v6, %v936_v7  ;;  %v4765_v6 = vld [vmem:[%s4655_s1 + $0x408] sm:$0xff]  ;;  %v3711_v7 = vcombine.high %v1012_v0, %v1016_v1 }
 0x11a   : > { %2993 = vmatpush1.bf16.msra.mxu0 %v3606_v59  ;;  %v3694_v59 = vcombine.low %v996_v46, %v1000_v47  ;;  %v1051_v46 = vld [vmem:[%s4655_s1 + $0x480] sm:$0xff] }
 0x11b   : > { %2994 = vmatprep.subr.bf16.mxu0 %v3615_v60  ;;  %2894 = vmatpush1.bf16.msra.mxu1 %v3700_v40  ;;  %v1027_v60 = vld [vmem:[%s4655_s1 + $0x3c0] sm:$0xff] }
 0x11c   : > { %2895 = vmatprep.subr.bf16.mxu1 %v3709_v45  ;;  %v3725_v63 = vcombine.high %v1027_v60, %v1031_v61  ;;  %v3724_v2 = vcombine.low %v1027_v60, %v1031_v61  ;;  %v3743_v45 = vcombine.high %v1044_v38, %v1048_v39  ;;  %v1055_v47 = vld [vmem:[%s4655_s1 + $0x4a0] sm:$0xff] }
 0x11d   : > { %v1059_v60 = vld [vmem:[%s4655_s1 + $0x4c0] sm:$0xff] }
 0x11e   : > { %2995 = vmatpush1.bf16.msra.mxu0 %v3614_v3  ;;  %v3702_v3 = vcombine.low %v1004_v56, %v1008_v57 }
 0x11f   : > { %2996 = vmatprep.subr.bf16.mxu0 %v3623_v4  ;;  %2896 = vmatpush1.bf16.msra.mxu1 %v3708_v48  ;;  %v4759_v4 = vld [vmem:[%s4655_s1 + $0x400] sm:$0xff]  ;;  %v1052_v48 = vld [vmem:[%s4655_s1 + $0x488] sm:$0xff] }
 0x120   : > { %2897 = vmatprep.subr.bf16.mxu1 %v3717_v55  ;;  %v3733_v8 = vcombine.high %v4759_v4, %v4762_v5  ;;  %v3732_v11 = vcombine.low %v4759_v4, %v4762_v5  ;;  %v3742_v55 = vcombine.low %v1044_v38, %v1048_v39  ;;  %v1067_v5 = vld [vmem:[%s4655_s1 + $0x500] sm:$0xff]  ;;  %v1096_v38 = vld [vmem:[%s4655_s1 + $0x5e8] sm:$0xff] }
 0x122   : > { %2997 = vmatpush1.bf16.msra.mxu0 %v3622_v9  ;;  %v1040_v9 = vld [vmem:[%s4655_s1 + $0x428] sm:$0xff] }
 0x123   : > { %2998 = vmatprep.subr.bf16.mxu0 %v3631_v50  ;;  %2898 = vmatpush1.bf16.msra.mxu1 %v3716_v58  ;;  %v1020_v50 = vld [vmem:[%s4655_s1 + $0x388] sm:$0xff]  ;;  %v3734_v12 = vcombine.low %v4765_v6, %v1040_v9  ;;  %v3735_v20 = vcombine.high %v4765_v6, %v1040_v9  ;;  %v3749_v58 = vcombine.high %v1051_v46, %v1055_v47  ;;  %v1071_v6 = vld [vmem:[%s4655_s1 + $0x520] sm:$0xff] }
 0x124   : > { %2899 = vmatprep.subr.bf16.mxu1 %v3725_v63  ;;  %v1060_v63 = vld [vmem:[%s4655_s1 + $0x4c8] sm:$0xff] }
 0x126   : > { %2999 = vmatpush1.bf16.msra.mxu0 %v3630_v13  ;;  %v3710_v13 = vcombine.low %v1012_v0, %v1016_v1  ;;  %v1064_v0 = vld [vmem:[%s4655_s1 + $0x4e8] sm:$0xff]  ;;  %v3748_v1 = vcombine.low %v1051_v46, %v1055_v47  ;;  %v1103_v46 = vld [vmem:[%s4655_s1 + $0x620] sm:$0xff] }
 0x127   : > { %3000 = vmatprep.subr.bf16.mxu0 %v3639_v14  ;;  %2900 = vmatpush1.bf16.msra.mxu1 %v3724_v2  ;;  %v3719_v14 = vcombine.high %v1020_v50, %v1024_v10  ;;  %v3759_v4 = vcombine.high %v1060_v63, %v1064_v0  ;;  %v1100_v47 = vld [vmem:[%s4655_s1 + $0x608] sm:$0xff] }
 0x128   : > { %2910 = vmatprep.subr.bf16.mxu1 %v3733_v8  ;;  %v1072_v8 = vld [vmem:[%s4655_s1 + $0x528] sm:$0xff] }
 0x12a   : > { %3001 = vmatpush1.bf16.msra.mxu0 %v3638_v17  ;;  %v3718_v17 = vcombine.low %v1020_v50, %v1024_v10  ;;  %v3758_v50 = vcombine.low %v1060_v63, %v1064_v0  ;;  %v3765_v10 = vcombine.high %v1067_v5, %v1071_v6  ;;  %v1115_v0 = vld [vmem:[%s4655_s1 + $0x680] sm:$0xff] }
 0x12b   : > { %3002 = vmatprep.subr.bf16.mxu0 %v3647_v18  ;;  %v3727_v18 = vcombine.high %v1028_v15, %v1032_v16  ;;  %v1080_v15 = vld [vmem:[%s4655_s1 + $0x568] sm:$0xff] }
 0x12e   : > { %3003 = vmatpush1.bf16.msra.mxu0 %v3646_v21  ;;  %v405_v21 = vlaneseq }
 0x12f   : > { %3004 = vmatprep.subr.bf16.mxu0 %v3655_v22 }
 0x130   : > { %v4778_v22 = vshrl.u32 %v405_v21, 7  ;;  %v1083_v21 = vld [vmem:[%s4655_s1 + $0x580] sm:$0xff] }
 0x132   : > { %3005 = vmatpush1.bf16.msra.mxu0 %v3654_v25  ;;  %v407_v23 = vsub.s32 0, %v4778_v22  ;;  %v411_v25 = vsub.s32 1, %v4778_v22  ;;  %v419_v34 = vsub.s32 3, %v4778_v22 }
 0x133   : > { %3006 = vmatprep.subr.bf16.mxu0 %v3663_v26 }
 0x134   : > { %v408_v26 = vrot.slane %v4781_v24, %v407_v23  ;;  %v412_v27 = vrot.slane %v4781_v24, %v411_v25  ;;  %v420_v42 = vrot.slane %v4781_v24, %v419_v34 }
 0x136   : > { %3007 = vmatpush1.bf16.msra.mxu0 %v3662_v29 }
 0x137   : > { %3008 = vmatprep.subr.bf16.mxu0 %v3671_v30 }
 0x13a   : > { %3009 = vmatpush1.bf16.msra.mxu0 %v3670_v33 }
 0x13b   : > { %3010 = vmatprep.subr.bf16.mxu0 %v3679_v36 }
 0x13e   : > { %3011 = vmatpush1.bf16.msra.mxu0 %v3678_v41 }
 0x13f   : > { %3012 = vmatprep.subr.bf16.mxu0 %v3687_v44  ;;  %v3741_v44 = vcombine.high %v1043_v35, %v1047_v37 }
 0x142   : > { %3013 = vmatpush1.bf16.msra.mxu0 %v3686_v49  ;;  %v1056_v49 = vld [vmem:[%s4655_s1 + $0x4a8] sm:$0xff] }
 0x143   : > { %3014 = vmatprep.subr.bf16.mxu0 %v3695_v54  ;;  %v3740_v54 = vcombine.low %v1043_v35, %v1047_v37  ;;  %v3750_v2 = vcombine.low %v1052_v48, %v1056_v49  ;;  %v1091_v35 = vld [vmem:[%s4655_s1 + $0x5c0] sm:$0xff]  ;;  %v1092_v37 = vld [vmem:[%s4655_s1 + $0x5c8] sm:$0xff] }
 0x146   : > { %3015 = vmatpush1.bf16.msra.mxu0 %v3694_v59  ;;  %v3751_v59 = vcombine.high %v1052_v48, %v1056_v49  ;;  %v1104_v48 = vld [vmem:[%s4655_s1 + $0x628] sm:$0xff] }
 0x147   : > { %3016 = vmatprep.subr.bf16.mxu0 %v3703_v62  ;;  %v1063_v62 = vld [vmem:[%s4655_s1 + $0x4e0] sm:$0xff] }
 0x148   : > { %v3756_v9 = vcombine.low %v1059_v60, %v1063_v62 }
 0x14a   : > { %3017 = vmatpush1.bf16.msra.mxu0 %v3702_v3  ;;  %v3757_v3 = vcombine.high %v1059_v60, %v1063_v62 }
 0x14b   : > { %3018 = vmatprep.subr.bf16.mxu0 %v3711_v7  ;;  %v1068_v7 = vld [vmem:[%s4655_s1 + $0x508] sm:$0xff] }
 0x14e   : > { %3019 = vmatpush1.bf16.msra.mxu0 %v3710_v13  ;;  %v1079_v13 = vld [vmem:[%s4655_s1 + $0x560] sm:$0xff] }
 0x14f   : > { %3020 = vmatprep.subr.bf16.mxu0 %v3719_v14  ;;  %v1076_v14 = vld [vmem:[%s4655_s1 + $0x548] sm:$0xff] }
 0x152   : > { %3021 = vmatpush1.bf16.msra.mxu0 %v3718_v17  ;;  %v3764_v17 = vcombine.low %v1067_v5, %v1071_v6 }
 0x153   : > { %3022 = vmatprep.subr.bf16.mxu0 %v3727_v18  ;;  %v3766_v18 = vcombine.low %v1068_v7, %v1072_v8 }
 0x156   : > { %3023 = vmatpush1.bf16.msra.mxu0 %v3726_v19 }
 0x157   : > { %3033 = vmatprep.subr.bf16.mxu0 %v3735_v20  ;;  %v3775_v20 = vcombine.high %v1076_v14, %v1080_v15 }
 0x1b8   : > { %v809_v28 = vpop.f32.mrb[0].mxu0 }
 0x1b9   : > { %v810_v29 = vadd.f32 %v809_v28, %v408_v26  ;;  %v811_v30 = vpop.f32.mrb[1].mxu0  ;;  %v1084_v28 = vld [vmem:[%s4655_s1 + $0x588] sm:$0xff] }
 0x1ba   : > { %v812_v31 = vadd.f32 %v811_v30, %v412_v27  ;;  %v813_v32 = vpop.f32.mrb[2].mxu0  ;;  %v1087_v27 = vld [vmem:[%s4655_s1 + $0x5a0] sm:$0xff] }
 0x1bb   : > { %4150 = vtanh.f32 %v810_v29  ;;  %v814_v33 = vpop.f32.mrb[3].mxu0  ;;  %v1088_v29 = vld [vmem:[%s4655_s1 + $0x5a8] sm:$0xff]  ;;  %v3781_v32 = vcombine.high %v1083_v21, %v1087_v27  ;;  %v3780_v39 = vcombine.low %v1083_v21, %v1087_v27  ;;  %v1135_v27 = vld [vmem:[%s4655_s1 + $0x720] sm:$0xff] }
 0x1bc   : > { %4152 = vtanh.f32 %v812_v31  ;;  %v3774_v31 = vcombine.low %v1076_v14, %v1080_v15  ;;  %v3783_v33 = vcombine.high %v1084_v28, %v1088_v29 }
 0x1bd   : > { %v4808_v51 = vpop.f32.mrb[0].mxu1 }
 0x1be   : > { %v852_v53 = vpop.f32.mrb[1].mxu1 }
 0x1bf   : > { %v853_v56 = vadd.f32 %v852_v53, %v420_v42  ;;  %v854_v57 = vpop.f32.mrb[2].mxu1  ;;  %v3790_v53 = vcombine.low %v1092_v37, %v1096_v38 }
 0x1c0   : > { %v855_v61 = vpop.f32.mrb[3].mxu1  ;;  %v1111_v57 = vld [vmem:[%s4655_s1 + $0x660] sm:$0xff] }
 0x1c1   : > { %4154 = vtanh.f32 %v853_v56  ;;  %v1107_v56 = vld [vmem:[%s4655_s1 + $0x640] sm:$0xff]  ;;  %v3798_v61 = vcombine.low %v1100_v47, %v1104_v48 }
 0x1c2   : > { %v3805_v62 = vcombine.high %v1107_v56, %v1111_v57 }
 0x1c5   : > { %v4151_v36 = vpop.eup %4150 }
 0x1c6   : > { %v4153_v40 = vpop.eup %4152  ;;  %v4800_v43 = vpack.c.bf16 %v4151_v36, %v4151_v36  ;;  %v1095_v36 = vld [vmem:[%s4655_s1 + $0x5e0] sm:$0xff] }
 0x1c7   : > { %v4795_v41 = vpack.c.bf16 %v4153_v40, %v4153_v40  ;;  %v3782_v40 = vcombine.low %v1084_v28, %v1088_v29  ;;  %v3789_v42 = vcombine.high %v1091_v35, %v1095_v36  ;;  %v3788_v49 = vcombine.low %v1091_v35, %v1095_v36  ;;  %v1132_v28 = vld [vmem:[%s4655_s1 + $0x708] sm:$0xff]  ;;  %v1139_v35 = vld [vmem:[%s4655_s1 + $0x740] sm:$0xff] }
 0x1c8   : > { %v1136_v29 = vld [vmem:[%s4655_s1 + $0x728] sm:$0xff] }
 0x1c9   : > { %2901 = vmatprep.mubr.bf16.mxu1 %v4795_v41  ;;  %3024 = vmatprep.mubr.bf16.mxu0 %v4795_v41 }
 0x1ca   : > { %2902 = vmatmul.mubr.bf16.vlgmr.msra.gmra.mrb[4].mxu1 %v4800_v43  ;;  %3025 = vmatmul.mubr.bf16.vlgmr.msra.gmra.mrb[8].mxu0 %v4800_v43 }
 0x1cb   : > { %2911 = vmatpush1.bf16.msra.mxu1 %v3732_v11  ;;  %3034 = vmatpush1.bf16.msra.mxu0 %v3734_v12  ;;  %v3767_v11 = vcombine.high %v1068_v7, %v1072_v8  ;;  %v1075_v12 = vld [vmem:[%s4655_s1 + $0x540] sm:$0xff]  ;;  %v4155_v16 = vpop.eup %4154 }
 0x1cc   : > { %2912 = vmatprep.subr.bf16.mxu1 %v3741_v44  ;;  %3035 = vmatprep.subr.bf16.mxu0 %v3743_v45  ;;  %v3773_v19 = vcombine.high %v1075_v12, %v1079_v13  ;;  %v4825_v26 = vpack.c.bf16 %v4155_v16, %v4155_v16  ;;  %v3772_v30 = vcombine.low %v1075_v12, %v1079_v13  ;;  %v1099_v45 = vld [vmem:[%s4655_s1 + $0x600] sm:$0xff]  ;;  %v1128_v12 = vld [vmem:[%s4655_s1 + $0x6e8] sm:$0xff] }
 0x1cd   : > { %v3791_v44 = vcombine.high %v1092_v37, %v1096_v38  ;;  %v3796_v60 = vcombine.low %v1099_v45, %v1103_v46  ;;  %v1123_v8 = vld [vmem:[%s4655_s1 + $0x6c0] sm:$0xff]  ;;  %v1140_v38 = vld [vmem:[%s4655_s1 + $0x748] sm:$0xff] }
 0x1ce   : > { %2942 = vmatprep.mubr.bf16.mxu1 %v4825_v26  ;;  %3065 = vmatprep.mubr.bf16.mxu0 %v4825_v26  ;;  %v1143_v37 = vld [vmem:[%s4655_s1 + $0x760] sm:$0xff] }
 0x1cf   : > { %2913 = vmatpush1.bf16.msra.mxu1 %v3740_v54  ;;  %3036 = vmatpush1.bf16.msra.mxu0 %v3742_v55  ;;  %v3797_v54 = vcombine.high %v1099_v45, %v1103_v46  ;;  %v3799_v55 = vcombine.high %v1100_v47, %v1104_v48  ;;  %v1147_v46 = vld [vmem:[%s4655_s1 + $0x780] sm:$0xff]  ;;  %v1152_v48 = vld [vmem:[%s4655_s1 + $0x7a8] sm:$0xff] }
 0x1d0   : > { %2914 = vmatprep.subr.bf16.mxu1 %v3749_v58  ;;  %3037 = vmatprep.subr.bf16.mxu0 %v3751_v59  ;;  %v1108_v58 = vld [vmem:[%s4655_s1 + $0x648] sm:$0xff]  ;;  %v1151_v47 = vld [vmem:[%s4655_s1 + $0x7a0] sm:$0xff] }
 0x1d1   : > { %v1112_v59 = vld [vmem:[%s4655_s1 + $0x668] sm:$0xff] }
 0x1d2   : > { %v3807_v63 = vcombine.high %v1108_v58, %v1112_v59  ;;  %v3806_v5 = vcombine.low %v1108_v58, %v1112_v59  ;;  %v1156_v58 = vld [vmem:[%s4655_s1 + $0x7c8] sm:$0xff] }
 0x1d3   : > { %2915 = vmatpush1.bf16.msra.mxu1 %v3748_v1  ;;  %3038 = vmatpush1.bf16.msra.mxu0 %v3750_v2  ;;  %v1119_v1 = vld [vmem:[%s4655_s1 + $0x6a0] sm:$0xff]  ;;  %v1116_v2 = vld [vmem:[%s4655_s1 + $0x688] sm:$0xff] }
 0x1d4   : > { %2916 = vmatprep.subr.bf16.mxu1 %v3757_v3  ;;  %3039 = vmatprep.subr.bf16.mxu0 %v3759_v4  ;;  %v1120_v3 = vld [vmem:[%s4655_s1 + $0x6a8] sm:$0xff]  ;;  %v3804_v4 = vcombine.low %v1107_v56, %v1111_v57  ;;  %v3813_v6 = vcombine.high %v1115_v0, %v1119_v1  ;;  %v3812_v15 = vcombine.low %v1115_v0, %v1119_v1  ;;  %v1155_v56 = vld [vmem:[%s4655_s1 + $0x7c0] sm:$0xff] }
 0x1d5   : > { %v3815_v7 = vcombine.high %v1116_v2, %v1120_v3  ;;  %v3814_v16 = vcombine.low %v1116_v2, %v1120_v3  ;;  %v1159_v57 = vld [vmem:[%s4655_s1 + $0x7e0] sm:$0xff]  ;;  %v1160_v59 = vld [vmem:[%s4655_s1 + $0x7e8] sm:$0xff]  ;;  %v910_v2 = vld [vmem:[%s4655_s1 + $0x18] sm:$0xff] }
 0x1d6   : > { %v1163_v0 = vld [vmem:[%s4655_s1 + $0x800] sm:$0xff]  ;;  %v914_v3 = vld [vmem:[%s4655_s1 + $0x38] sm:$0xff] }
 0x1d7   : > { %2917 = vmatpush1.bf16.msra.mxu1 %v3756_v9  ;;  %3040 = vmatpush1.bf16.msra.mxu0 %v3758_v50  ;;  %v415_v50 = vsub.s32 2, %v4778_v22  ;;  %v1167_v1 = vld [vmem:[%s4655_s1 + $0x820] sm:$0xff] }
 0x1d8   : > { %2918 = vmatprep.subr.bf16.mxu1 %v3765_v10  ;;  %3041 = vmatprep.subr.bf16.mxu0 %v3767_v11  ;;  %v1127_v10 = vld [vmem:[%s4655_s1 + $0x6e0] sm:$0xff]  ;;  %v1124_v11 = vld [vmem:[%s4655_s1 + $0x6c8] sm:$0xff] }
 0x1d9   : > { %v416_v21 = vrot.slane %v4781_v24, %v415_v50 }
 0x1db   : > { %2919 = vmatpush1.bf16.msra.mxu1 %v3764_v17  ;;  %3042 = vmatpush1.bf16.msra.mxu0 %v3766_v18  ;;  %v3821_v18 = vcombine.high %v1123_v8, %v1127_v10  ;;  %v851_v36 = vadd.f32 %v4808_v51, %v416_v21  ;;  %v1148_v51 = vld [vmem:[%s4655_s1 + $0x788] sm:$0xff]  ;;  %v926_v21 = vld [vmem:[%s4655_s1 + $0x98] sm:$0xff] }
 0x1dc   : > { %2920 = vmatprep.subr.bf16.mxu1 %v3773_v19  ;;  %3043 = vmatprep.subr.bf16.mxu0 %v3775_v20  ;;  %v3823_v19 = vcombine.high %v1124_v11, %v1128_v12  ;;  %v1131_v20 = vld [vmem:[%s4655_s1 + $0x700] sm:$0xff] }
 0x1dd   : > { %4156 = vtanh.f32 %v851_v36  ;;  %v938_v36 = vld [vmem:[%s4655_s1 + $0xf8] sm:$0xff] }
 0x1df   : > { %2921 = vmatpush1.bf16.msra.mxu1 %v3772_v30  ;;  %3044 = vmatpush1.bf16.msra.mxu0 %v3774_v31  ;;  %v3820_v30 = vcombine.low %v1123_v8, %v1127_v10  ;;  %v3822_v31 = vcombine.low %v1124_v11, %v1128_v12  ;;  %v3611_v8 = vcombine.high %v910_v2, %v914_v3  ;;  %v1171_v10 = vld [vmem:[%s4655_s1 + $0x840] sm:$0xff] }
 0x1e0   : > { %2922 = vmatprep.subr.bf16.mxu1 %v3781_v32  ;;  %3045 = vmatprep.subr.bf16.mxu0 %v3783_v33  ;;  %v3829_v32 = vcombine.high %v1131_v20, %v1135_v27  ;;  %v3831_v33 = vcombine.high %v1132_v28, %v1136_v29  ;;  %v1175_v11 = vld [vmem:[%s4655_s1 + $0x860] sm:$0xff] }
 0x1e3   : > { %2923 = vmatpush1.bf16.msra.mxu1 %v3780_v39  ;;  %3046 = vmatpush1.bf16.msra.mxu0 %v3782_v40  ;;  %v1144_v39 = vld [vmem:[%s4655_s1 + $0x768] sm:$0xff]  ;;  %v3828_v40 = vcombine.low %v1131_v20, %v1135_v27  ;;  %v1183_v20 = vld [vmem:[%s4655_s1 + $0x8a0] sm:$0xff]  ;;  %v930_v27 = vld [vmem:[%s4655_s1 + $0xb8] sm:$0xff] }
 0x1e4   : > { %2924 = vmatprep.subr.bf16.mxu1 %v3789_v42  ;;  %3047 = vmatprep.subr.bf16.mxu0 %v3791_v44  ;;  %v3830_v42 = vcombine.low %v1132_v28, %v1136_v29  ;;  %v3837_v44 = vcombine.high %v1139_v35, %v1143_v37  ;;  %v3839_v45 = vcombine.high %v1140_v38, %v1144_v39 }
 0x1e5   : > { %v3868_v28 = vcombine.low %v1171_v10, %v1175_v11 }
 0x1e7   : > { %2925 = vmatpush1.bf16.msra.mxu1 %v3788_v49  ;;  %3048 = vmatpush1.bf16.msra.mxu0 %v3790_v53  ;;  %v3836_v49 = vcombine.low %v1139_v35, %v1143_v37  ;;  %v3838_v53 = vcombine.low %v1140_v38, %v1144_v39  ;;  %v934_v35 = vld [vmem:[%s4655_s1 + $0xd8] sm:$0xff]  ;;  %v423_v37 = vsub.s32 4, %v4778_v22  ;;  %v3626_v39 = vcombine.low %v926_v21, %v930_v27 }
 0x1e8   : > { %2926 = vmatprep.subr.bf16.mxu1 %v3797_v54  ;;  %3049 = vmatprep.subr.bf16.mxu0 %v3799_v55  ;;  %v3845_v54 = vcombine.high %v1147_v46, %v1151_v47  ;;  %v3847_v55 = vcombine.high %v1148_v51, %v1152_v48 }
 0x1eb   : > { %2927 = vmatpush1.bf16.msra.mxu1 %v3796_v60  ;;  %3050 = vmatpush1.bf16.msra.mxu0 %v3798_v61  ;;  %v3844_v60 = vcombine.low %v1147_v46, %v1151_v47  ;;  %v3846_v61 = vcombine.low %v1148_v51, %v1152_v48  ;;  %v1199_v46 = vld [vmem:[%s4655_s1 + $0x920] sm:$0xff]  ;;  %v942_v47 = vld [vmem:[%s4655_s1 + $0x118] sm:$0xff] }
 0x1ec   : > { %2928 = vmatprep.subr.bf16.mxu1 %v3805_v62  ;;  %3051 = vmatprep.subr.bf16.mxu0 %v3807_v63  ;;  %v4849_v9 = vpop.f32.mrb[4].mxu0  ;;  %v3853_v62 = vcombine.high %v1155_v56, %v1159_v57  ;;  %v3855_v63 = vcombine.high %v1156_v58, %v1160_v59  ;;  %v946_v51 = vld [vmem:[%s4655_s1 + $0x138] sm:$0xff] }
 0x1ed   : > { %v893_v13 = vpop.f32.mrb[5].mxu0 }
 0x1ee   : > { %v894_v14 = vpop.f32.mrb[6].mxu0  ;;  %v918_v13 = vld [vmem:[%s4655_s1 + $0x58] sm:$0xff] }
 0x1ef   : > { %2929 = vmatpush1.bf16.msra.mxu1 %v3804_v4  ;;  %3052 = vmatpush1.bf16.msra.mxu0 %v3806_v5  ;;  %v895_v17 = vpop.f32.mrb[7].mxu0  ;;  %v4157_v4 = vpop.eup %4156  ;;  %v3852_v5 = vcombine.low %v1155_v56, %v1159_v57  ;;  %v922_v14 = vld [vmem:[%s4655_s1 + $0x78] sm:$0xff] }
 0x1f0   : > { %2930 = vmatprep.subr.bf16.mxu1 %v3813_v6  ;;  %3053 = vmatprep.subr.bf16.mxu0 %v3815_v7  ;;  %v3854_v6 = vcombine.low %v1156_v58, %v1160_v59  ;;  %v3861_v7 = vcombine.high %v1163_v0, %v1167_v1  ;;  %v4881_v12 = vpack.c.bf16 %v4157_v4, %v4157_v4  ;;  %v950_v57 = vld [vmem:[%s4655_s1 + $0x158] sm:$0xff] }
 0x1f1   : > { %v3869_v17 = vcombine.high %v1171_v10, %v1175_v11  ;;  %v3618_v29 = vcombine.low %v918_v13, %v922_v14  ;;  %v954_v58 = vld [vmem:[%s4655_s1 + $0x178] sm:$0xff] }
 0x1f2   : > { %v970_v10 = vld [vmem:[%s4655_s1 + $0x1f8] sm:$0xff] }
 0x1f3   : > { %2931 = vmatpush1.bf16.msra.mxu1 %v3812_v15  ;;  %3054 = vmatpush1.bf16.msra.mxu0 %v3814_v16  ;;  %v3860_v15 = vcombine.low %v1163_v0, %v1167_v1  ;;  %v3610_v16 = vcombine.low %v910_v2, %v914_v3  ;;  %v1215_v0 = vld [vmem:[%s4655_s1 + $0x9a0] sm:$0xff]  ;;  %v962_v1 = vld [vmem:[%s4655_s1 + $0x1b8] sm:$0xff]  ;;  %v3650_v3 = vcombine.low %v950_v57, %v954_v58 }
 0x1f4   : > { %2932 = vmatprep.subr.bf16.mxu1 %v3821_v18  ;;  %3055 = vmatprep.subr.bf16.mxu0 %v3823_v19  ;;  %v1179_v18 = vld [vmem:[%s4655_s1 + $0x880] sm:$0xff]  ;;  %v3619_v19 = vcombine.high %v918_v13, %v922_v14 }
 0x1f5   : > { %v3876_v38 = vcombine.low %v1179_v18, %v1183_v20 }
 0x1f7   : > { %2933 = vmatpush1.bf16.msra.mxu1 %v3820_v30  ;;  %3056 = vmatpush1.bf16.msra.mxu0 %v3822_v31  ;;  %v3877_v30 = vcombine.high %v1179_v18, %v1183_v20  ;;  %v3627_v31 = vcombine.high %v926_v21, %v930_v27  ;;  %v974_v18 = vld [vmem:[%s4655_s1 + $0x218] sm:$0xff] }
 0x1f8   : > { %2934 = vmatprep.subr.bf16.mxu1 %v3829_v32  ;;  %3057 = vmatprep.subr.bf16.mxu0 %v3831_v33  ;;  %v1187_v32 = vld [vmem:[%s4655_s1 + $0x8c0] sm:$0xff] }
 0x1f9   : > { %v1191_v33 = vld [vmem:[%s4655_s1 + $0x8e0] sm:$0xff] }
 0x1fa   : > { %v3884_v48 = vcombine.low %v1187_v32, %v1191_v33 }
 0x1fb   : > { %2935 = vmatpush1.bf16.msra.mxu1 %v3828_v40  ;;  %3058 = vmatpush1.bf16.msra.mxu0 %v3830_v42  ;;  %v3885_v40 = vcombine.high %v1187_v32, %v1191_v33  ;;  %v3635_v42 = vcombine.high %v934_v35, %v938_v36  ;;  %v982_v32 = vld [vmem:[%s4655_s1 + $0x258] sm:$0xff] }
 0x1fc   : > { %2936 = vmatprep.subr.bf16.mxu1 %v3837_v44  ;;  %3059 = vmatprep.subr.bf16.mxu0 %v3839_v45  ;;  %v1195_v44 = vld [vmem:[%s4655_s1 + $0x900] sm:$0xff]  ;;  %v424_v45 = vrot.slane %v4781_v24, %v423_v37  ;;  %v986_v33 = vld [vmem:[%s4655_s1 + $0x278] sm:$0xff] }
 0x1fd   : > { %v1207_v24 = vld [vmem:[%s4655_s1 + $0x960] sm:$0xff]  ;;  %v3892_v59 = vcombine.low %v1195_v44, %v1199_v46 }
 0x1fe   : > { %v892_v56 = vadd.f32 %v4849_v9, %v424_v45  ;;  %v958_v9 = vld [vmem:[%s4655_s1 + $0x198] sm:$0xff] }
 0x1ff   : > { %2937 = vmatpush1.bf16.msra.mxu1 %v3836_v49  ;;  %3060 = vmatpush1.bf16.msra.mxu0 %v3838_v53  ;;  %v3634_v49 = vcombine.low %v934_v35, %v938_v36  ;;  %v3893_v53 = vcombine.high %v1195_v44, %v1199_v46  ;;  %v3658_v13 = vcombine.low %v958_v9, %v962_v1  ;;  %v1184_v44 = vld [vmem:[%s4655_s1 + $0x8a8] sm:$0xff]  ;;  %v990_v45 = vld [vmem:[%s4655_s1 + $0x298] sm:$0xff] }
 0x200   : > { %2938 = vmatprep.subr.bf16.mxu1 %v3845_v54  ;;  %3061 = vmatprep.subr.bf16.mxu0 %v3847_v55  ;;  %v3643_v54 = vcombine.high %v942_v47, %v946_v51  ;;  %v1203_v55 = vld [vmem:[%s4655_s1 + $0x940] sm:$0xff]  ;;  %4158 = vtanh.f32 %v892_v56  ;;  %v994_v46 = vld [vmem:[%s4655_s1 + $0x2b8] sm:$0xff] }
 0x201   : > { %v3900_v2 = vcombine.low %v1203_v55, %v1207_v24  ;;  %v1002_v56 = vld [vmem:[%s4655_s1 + $0x2f8] sm:$0xff] }
 0x203   : > { %2939 = vmatpush1.bf16.msra.mxu1 %v3844_v60  ;;  %3062 = vmatpush1.bf16.msra.mxu0 %v3846_v61  ;;  %v3642_v60 = vcombine.low %v942_v47, %v946_v51  ;;  %v3901_v61 = vcombine.high %v1203_v55, %v1207_v24  ;;  %v3682_v51 = vcombine.low %v982_v32, %v986_v33  ;;  %v998_v55 = vld [vmem:[%s4655_s1 + $0x2d8] sm:$0xff] }
 0x204   : > { %2940 = vmatprep.subr.bf16.mxu1 %v3853_v62  ;;  %3063 = vmatprep.subr.bf16.mxu0 %v3855_v63  ;;  %v3651_v62 = vcombine.high %v950_v57, %v954_v58  ;;  %v1211_v63 = vld [vmem:[%s4655_s1 + $0x980] sm:$0xff]  ;;  %v3690_v57 = vcombine.low %v990_v45, %v994_v46 }
 0x205   : > { %v3909_v4 = vcombine.high %v1211_v63, %v1215_v0  ;;  %v3908_v11 = vcombine.low %v1211_v63, %v1215_v0  ;;  %v1010_v63 = vld [vmem:[%s4655_s1 + $0x338] sm:$0xff] }
 0x207   : > { %2941 = vmatpush1.bf16.msra.mxu1 %v3852_v5  ;;  %3064 = vmatpush1.bf16.msra.mxu0 %v3854_v6  ;;  %v3659_v5 = vcombine.high %v958_v9, %v962_v1  ;;  %v1219_v6 = vld [vmem:[%s4655_s1 + $0x9c0] sm:$0xff]  ;;  %v3698_v9 = vcombine.low %v998_v55, %v1002_v56 }
 0x208   : > { %2951 = vmatprep.subr.bf16.mxu1 %v3861_v7  ;;  %3238 = vmatprep.subr.bf16.mxu0 %v3611_v8  ;;  %v1223_v7 = vld [vmem:[%s4655_s1 + $0x9e0] sm:$0xff]  ;;  %v966_v8 = vld [vmem:[%s4655_s1 + $0x1d8] sm:$0xff] }
 0x209   : > { %v3917_v14 = vcombine.high %v1219_v6, %v1223_v7  ;;  %v3916_v21 = vcombine.low %v1219_v6, %v1223_v7  ;;  %v3666_v27 = vcombine.low %v966_v8, %v970_v10  ;;  %v1018_v6 = vld [vmem:[%s4655_s1 + $0x378] sm:$0xff] }
 0x20a   : > { %2943 = vmatmul.mubr.bf16.vlgmr.msra.gmra.mrb[4].mxu1 %v4881_v12  ;;  %3066 = vmatmul.mubr.bf16.vlgmr.msra.gmra.mrb[8].mxu0 %v4881_v12  ;;  %v4159_v20 = vpop.eup %4158 }
 0x20b   : > { %2952 = vmatpush1.bf16.msra.mxu1 %v3860_v15  ;;  %3239 = vmatpush1.bf16.msra.mxu0 %v3610_v16  ;;  %v3667_v15 = vcombine.high %v966_v8, %v970_v10  ;;  %v1164_v16 = vld [vmem:[%s4655_s1 + $0x808] sm:$0xff]  ;;  %v4926_v35 = vpack.c.bf16 %v4159_v20, %v4159_v20 }
 0x20c   : > { %3270 = vmatprep.mubr.bf16.mxu0 %v4795_v41  ;;  %2953 = vmatprep.subr.bf16.mxu1 %v3869_v17  ;;  %v1168_v17 = vld [vmem:[%s4655_s1 + $0x828] sm:$0xff] }
 0x20d   : > { %3240 = vmatprep.subr.bf16.mxu0 %v3619_v19  ;;  %2983 = vmatprep.mubr.bf16.mxu1 %v4390_v52  ;;  %v978_v19 = vld [vmem:[%s4655_s1 + $0x238] sm:$0xff]  ;;  %v3862_v36 = vcombine.low %v1164_v16, %v1168_v17 }
 0x20f   : > { %2954 = vmatpush1.bf16.msra.mxu1 %v3868_v28  ;;  %3241 = vmatpush1.bf16.msra.mxu0 %v3618_v29  ;;  %v3863_v28 = vcombine.high %v1164_v16, %v1168_v17  ;;  %v3675_v29 = vcombine.high %v974_v18, %v978_v19  ;;  %v1026_v16 = vld [vmem:[%s4655_s1 + $0x3b8] sm:$0xff] }
 0x210   : > { %2955 = vmatprep.subr.bf16.mxu1 %v3877_v30  ;;  %3242 = vmatprep.subr.bf16.mxu0 %v3627_v31  ;;  %v1172_v30 = vld [vmem:[%s4655_s1 + $0x848] sm:$0xff] }
 0x211   : > { %v1176_v31 = vld [vmem:[%s4655_s1 + $0x868] sm:$0xff] }
 0x212   : > { %v3870_v47 = vcombine.low %v1172_v30, %v1176_v31 }
 0x213   : > { %2956 = vmatpush1.bf16.msra.mxu1 %v3876_v38  ;;  %3243 = vmatpush1.bf16.msra.mxu0 %v3626_v39  ;;  %v3674_v38 = vcombine.low %v974_v18, %v978_v19  ;;  %v3871_v39 = vcombine.high %v1172_v30, %v1176_v31 }
 0x214   : > { %2957 = vmatprep.subr.bf16.mxu1 %v3885_v40  ;;  %3244 = vmatprep.subr.bf16.mxu0 %v3635_v42  ;;  %v3683_v40 = vcombine.high %v982_v32, %v986_v33  ;;  %v1180_v42 = vld [vmem:[%s4655_s1 + $0x888] sm:$0xff] }
 0x215   : > { %v3878_v24 = vcombine.low %v1180_v42, %v1184_v44 }
 0x217   : > { %2958 = vmatpush1.bf16.msra.mxu1 %v3884_v48  ;;  %3245 = vmatpush1.bf16.msra.mxu0 %v3634_v49  ;;  %v3879_v48 = vcombine.high %v1180_v42, %v1184_v44  ;;  %v3691_v49 = vcombine.high %v990_v45, %v994_v46 }
 0x218   : > { %2959 = vmatprep.subr.bf16.mxu1 %v3893_v53  ;;  %3246 = vmatprep.subr.bf16.mxu0 %v3643_v54  ;;  %v1188_v53 = vld [vmem:[%s4655_s1 + $0x8c8] sm:$0xff] }
 0x219   : > { %v1192_v54 = vld [vmem:[%s4655_s1 + $0x8e8] sm:$0xff] }
 0x21a   : > { %v3887_v58 = vcombine.high %v1188_v53, %v1192_v54  ;;  %v3886_v0 = vcombine.low %v1188_v53, %v1192_v54 }
 0x21b   : > { %2960 = vmatpush1.bf16.msra.mxu1 %v3892_v59  ;;  %3247 = vmatpush1.bf16.msra.mxu0 %v3642_v60  ;;  %v3699_v59 = vcombine.high %v998_v55, %v1002_v56  ;;  %v1196_v60 = vld [vmem:[%s4655_s1 + $0x908] sm:$0xff] }
 0x21c   : > { %2961 = vmatprep.subr.bf16.mxu1 %v3901_v61  ;;  %3248 = vmatprep.subr.bf16.mxu0 %v3651_v62  ;;  %v1200_v61 = vld [vmem:[%s4655_s1 + $0x928] sm:$0xff]  ;;  %v1006_v62 = vld [vmem:[%s4655_s1 + $0x318] sm:$0xff] }
 0x21d   : > { %v3895_v1 = vcombine.high %v1196_v60, %v1200_v61  ;;  %v3894_v7 = vcombine.low %v1196_v60, %v1200_v61  ;;  %v3706_v8 = vcombine.low %v1006_v62, %v1010_v63 }
 0x21f   : > { %2962 = vmatpush1.bf16.msra.mxu1 %v3900_v2  ;;  %3249 = vmatpush1.bf16.msra.mxu0 %v3650_v3  ;;  %v3707_v2 = vcombine.high %v1006_v62, %v1010_v63  ;;  %v1204_v3 = vld [vmem:[%s4655_s1 + $0x948] sm:$0xff] }
 0x220   : > { %2963 = vmatprep.subr.bf16.mxu1 %v3909_v4  ;;  %3250 = vmatprep.subr.bf16.mxu0 %v3659_v5  ;;  %v1208_v4 = vld [vmem:[%s4655_s1 + $0x968] sm:$0xff]  ;;  %v1014_v5 = vld [vmem:[%s4655_s1 + $0x358] sm:$0xff] }
 0x221   : > { %v3903_v10 = vcombine.high %v1204_v3, %v1208_v4  ;;  %v3902_v17 = vcombine.low %v1204_v3, %v1208_v4  ;;  %v3714_v18 = vcombine.low %v1014_v5, %v1018_v6 }
 0x223   : > { %2964 = vmatpush1.bf16.msra.mxu1 %v3908_v11  ;;  %3251 = vmatpush1.bf16.msra.mxu0 %v3658_v13  ;;  %v3715_v11 = vcombine.high %v1014_v5, %v1018_v6  ;;  %v1212_v13 = vld [vmem:[%s4655_s1 + $0x988] sm:$0xff]  ;;  %v941_v6 = vld [vmem:[%s4655_s1 + $0x110] sm:$0xff] }
 0x224   : > { %2965 = vmatprep.subr.bf16.mxu1 %v3917_v14  ;;  %3252 = vmatprep.subr.bf16.mxu0 %v3667_v15  ;;  %v1216_v14 = vld [vmem:[%s4655_s1 + $0x9a8] sm:$0xff]  ;;  %v1022_v15 = vld [vmem:[%s4655_s1 + $0x398] sm:$0xff] }
 0x225   : > { %v3911_v19 = vcombine.high %v1212_v13, %v1216_v14  ;;  %v3723_v20 = vcombine.high %v1022_v15, %v1026_v16  ;;  %v3910_v30 = vcombine.low %v1212_v13, %v1216_v14  ;;  %v3722_v31 = vcombine.low %v1022_v15, %v1026_v16  ;;  %v949_v16 = vld [vmem:[%s4655_s1 + $0x150] sm:$0xff] }
 0x227   : > { %2966 = vmatpush1.bf16.msra.mxu1 %v3916_v21  ;;  %3253 = vmatpush1.bf16.msra.mxu0 %v3666_v27  ;;  %v1220_v21 = vld [vmem:[%s4655_s1 + $0x9c8] sm:$0xff] }
 0x228   : > { %3074 = vmatprep.subr.bf16.mxu1 %v3863_v28  ;;  %3254 = vmatprep.subr.bf16.mxu0 %v3675_v29  ;;  %v1224_v27 = vld [vmem:[%s4655_s1 + $0x9e8] sm:$0xff]  ;;  %v1030_v28 = vld [vmem:[%s4655_s1 + $0x3d8] sm:$0xff] }
 0x229   : > { %v1034_v29 = vld [vmem:[%s4655_s1 + $0x3f8] sm:$0xff]  ;;  %v3919_v32 = vcombine.high %v1220_v21, %v1224_v27  ;;  %v3918_v42 = vcombine.low %v1220_v21, %v1224_v27 }
 0x22a   : > { %2984 = vmatmul.mubr.bf16.vlgmr.msra.gmra.mrb[4].mxu1 %v4926_v35  ;;  %v3731_v33 = vcombine.high %v1030_v28, %v1034_v29  ;;  %v3730_v44 = vcombine.low %v1030_v28, %v1034_v29  ;;  %v957_v29 = vld [vmem:[%s4655_s1 + $0x190] sm:$0xff] }
 0x22b   : > { %3075 = vmatpush1.bf16.msra.mxu1 %v3862_v36  ;;  %3255 = vmatpush1.bf16.msra.mxu0 %v3674_v38  ;;  %v909_v36 = vld [vmem:[%s4655_s1 + $0x10] sm:$0xff] }
 0x22c   : > { %3076 = vmatprep.subr.bf16.mxu1 %v3871_v39  ;;  %3256 = vmatprep.subr.bf16.mxu0 %v3683_v40  ;;  %v913_v38 = vld [vmem:[%s4655_s1 + $0x30] sm:$0xff]  ;;  %v1038_v39 = vld [vmem:[%s4655_s1 + $0x418] sm:$0xff] }
 0x22d   : > { %3106 = vmatprep.mubr.bf16.mxu1 %v4390_v52  ;;  %v1042_v40 = vld [vmem:[%s4655_s1 + $0x438] sm:$0xff]  ;;  %v3609_v45 = vcombine.high %v909_v36, %v913_v38  ;;  %v3608_v53 = vcombine.low %v909_v36, %v913_v38 }
 0x22e   : > { %v3739_v46 = vcombine.high %v1038_v39, %v1042_v40  ;;  %v3738_v54 = vcombine.low %v1038_v39, %v1042_v40  ;;  %v965_v40 = vld [vmem:[%s4655_s1 + $0x1d0] sm:$0xff] }
 0x22f   : > { %3077 = vmatpush1.bf16.msra.mxu1 %v3870_v47  ;;  %3257 = vmatpush1.bf16.msra.mxu0 %v3682_v51  ;;  %v917_v47 = vld [vmem:[%s4655_s1 + $0x50] sm:$0xff] }
 0x230   : > { %3078 = vmatprep.subr.bf16.mxu1 %v3879_v48  ;;  %3258 = vmatprep.subr.bf16.mxu0 %v3691_v49  ;;  %v921_v51 = vld [vmem:[%s4655_s1 + $0x70] sm:$0xff]  ;;  %v1046_v48 = vld [vmem:[%s4655_s1 + $0x458] sm:$0xff] }
 0x231   : > { %v1050_v49 = vld [vmem:[%s4655_s1 + $0x478] sm:$0xff]  ;;  %v3617_v55 = vcombine.high %v917_v47, %v921_v51  ;;  %v3616_v60 = vcombine.low %v917_v47, %v921_v51 }
 0x232   : > { %v3747_v56 = vcombine.high %v1046_v48, %v1050_v49  ;;  %v3746_v61 = vcombine.low %v1046_v48, %v1050_v49  ;;  %v973_v49 = vld [vmem:[%s4655_s1 + $0x210] sm:$0xff] }
 0x233   : > { %3079 = vmatpush1.bf16.msra.mxu1 %v3878_v24  ;;  %3259 = vmatpush1.bf16.msra.mxu0 %v3690_v57  ;;  %v925_v24 = vld [vmem:[%s4655_s1 + $0x90] sm:$0xff] }
 0x234   : > { %3080 = vmatprep.subr.bf16.mxu1 %v3887_v58  ;;  %3260 = vmatprep.subr.bf16.mxu0 %v3699_v59  ;;  %v929_v57 = vld [vmem:[%s4655_s1 + $0xb0] sm:$0xff]  ;;  %v1054_v58 = vld [vmem:[%s4655_s1 + $0x498] sm:$0xff] }
 0x235   : > { %v1058_v59 = vld [vmem:[%s4655_s1 + $0x4b8] sm:$0xff]  ;;  %v3625_v62 = vcombine.high %v925_v24, %v929_v57  ;;  %v3624_v3 = vcombine.low %v925_v24, %v929_v57 }
 0x236   : > { %v3755_v63 = vcombine.high %v1054_v58, %v1058_v59 }
 0x237   : > { %3081 = vmatpush1.bf16.msra.mxu1 %v3886_v0  ;;  %3261 = vmatpush1.bf16.msra.mxu0 %v3698_v9  ;;  %v933_v0 = vld [vmem:[%s4655_s1 + $0xd0] sm:$0xff] }
 0x238   : > { %3082 = vmatprep.subr.bf16.mxu1 %v3895_v1  ;;  %3262 = vmatprep.subr.bf16.mxu0 %v3707_v2  ;;  %v937_v9 = vld [vmem:[%s4655_s1 + $0xf0] sm:$0xff]  ;;  %v1062_v1 = vld [vmem:[%s4655_s1 + $0x4d8] sm:$0xff] }
 0x239   : > { %v1066_v2 = vld [vmem:[%s4655_s1 + $0x4f8] sm:$0xff]  ;;  %v3633_v4 = vcombine.high %v933_v0, %v937_v9 }
 0x23a   : > { %v3763_v5 = vcombine.high %v1062_v1, %v1066_v2  ;;  %v3762_v13 = vcombine.low %v1062_v1, %v1066_v2  ;;  %v989_v2 = vld [vmem:[%s4655_s1 + $0x290] sm:$0xff] }
 0x23b   : > { %3083 = vmatpush1.bf16.msra.mxu1 %v3894_v7  ;;  %3263 = vmatpush1.bf16.msra.mxu0 %v3706_v8  ;;  %v945_v7 = vld [vmem:[%s4655_s1 + $0x130] sm:$0xff]  ;;  %v1070_v8 = vld [vmem:[%s4655_s1 + $0x518] sm:$0xff] }
 0x23c   : > { %3084 = vmatprep.subr.bf16.mxu1 %v3903_v10  ;;  %3264 = vmatprep.subr.bf16.mxu0 %v3715_v11  ;;  %v1074_v10 = vld [vmem:[%s4655_s1 + $0x538] sm:$0xff]  ;;  %v3632_v11 = vcombine.low %v933_v0, %v937_v9  ;;  %v3641_v14 = vcombine.high %v941_v6, %v945_v7 }
 0x23d   : > { %v3771_v15 = vcombine.high %v1070_v8, %v1074_v10  ;;  %v3770_v21 = vcombine.low %v1070_v8, %v1074_v10  ;;  %v997_v10 = vld [vmem:[%s4655_s1 + $0x2d0] sm:$0xff] }
 0x23f   : > { %3085 = vmatpush1.bf16.msra.mxu1 %v3902_v17  ;;  %3265 = vmatpush1.bf16.msra.mxu0 %v3714_v18  ;;  %v953_v17 = vld [vmem:[%s4655_s1 + $0x170] sm:$0xff]  ;;  %v1078_v18 = vld [vmem:[%s4655_s1 + $0x558] sm:$0xff] }
 0x240   : > { %3086 = vmatprep.subr.bf16.mxu1 %v3911_v19  ;;  %3266 = vmatprep.subr.bf16.mxu0 %v3723_v20  ;;  %v1082_v19 = vld [vmem:[%s4655_s1 + $0x578] sm:$0xff]  ;;  %v3640_v20 = vcombine.low %v941_v6, %v945_v7  ;;  %v3649_v27 = vcombine.high %v949_v16, %v953_v17 }
 0x241   : > { %v3779_v28 = vcombine.high %v1078_v18, %v1082_v19  ;;  %v3778_v36 = vcombine.low %v1078_v18, %v1082_v19  ;;  %v1005_v19 = vld [vmem:[%s4655_s1 + $0x310] sm:$0xff] }
 0x243   : > { %3087 = vmatpush1.bf16.msra.mxu1 %v3910_v30  ;;  %3267 = vmatpush1.bf16.msra.mxu0 %v3722_v31  ;;  %v961_v30 = vld [vmem:[%s4655_s1 + $0x1b0] sm:$0xff]  ;;  %v1086_v31 = vld [vmem:[%s4655_s1 + $0x598] sm:$0xff] }
 0x244   : > { %3088 = vmatprep.subr.bf16.mxu1 %v3919_v32  ;;  %3268 = vmatprep.subr.bf16.mxu0 %v3731_v33  ;;  %v1090_v32 = vld [vmem:[%s4655_s1 + $0x5b8] sm:$0xff]  ;;  %v3648_v33 = vcombine.low %v949_v16, %v953_v17  ;;  %v3657_v38 = vcombine.high %v957_v29, %v961_v30 }
 0x245   : > { %v3787_v39 = vcombine.high %v1086_v31, %v1090_v32  ;;  %v3786_v47 = vcombine.low %v1086_v31, %v1090_v32  ;;  %v1013_v32 = vld [vmem:[%s4655_s1 + $0x350] sm:$0xff] }
 0x247   : > { %3089 = vmatpush1.bf16.msra.mxu1 %v3918_v42  ;;  %3269 = vmatpush1.bf16.msra.mxu0 %v3730_v44  ;;  %v969_v42 = vld [vmem:[%s4655_s1 + $0x1f0] sm:$0xff]  ;;  %v1094_v44 = vld [vmem:[%s4655_s1 + $0x5d8] sm:$0xff] }
 0x248   : > { %3115 = vmatprep.subr.bf16.mxu1 %v3609_v45  ;;  %3279 = vmatprep.subr.bf16.mxu0 %v3739_v46  ;;  %v1098_v45 = vld [vmem:[%s4655_s1 + $0x5f8] sm:$0xff]  ;;  %v3656_v46 = vcombine.low %v957_v29, %v961_v30  ;;  %v3665_v51 = vcombine.high %v965_v40, %v969_v42 }
 0x249   : > { %v3795_v48 = vcombine.high %v1094_v44, %v1098_v45  ;;  %v3794_v24 = vcombine.low %v1094_v44, %v1098_v45  ;;  %v1021_v45 = vld [vmem:[%s4655_s1 + $0x390] sm:$0xff] }
 0x24a   : > { %3107 = vmatmul.mubr.bf16.vlgmr.msra.gmra.mrb[8].mxu1 %v4926_v35  ;;  %3271 = vmatmul.mubr.bf16.vlgmr.msra.gmra.mrb[12].mxu0 %v4800_v43 }
 0x24b   : > { %3116 = vmatpush1.bf16.msra.mxu1 %v3608_v53  ;;  %3147 = vmatprep.mubr.bf16.mxu1 %v4795_v41  ;;  %v3754_v41 = vcombine.low %v1054_v58, %v1058_v59  ;;  %v977_v53 = vld [vmem:[%s4655_s1 + $0x230] sm:$0xff] }
 0x24c   : > { %3280 = vmatpush1.bf16.msra.mxu0 %v3738_v54  ;;  %3311 = vmatprep.mubr.bf16.mxu0 %v4825_v26  ;;  %v1102_v54 = vld [vmem:[%s4655_s1 + $0x618] sm:$0xff]  ;;  %v3673_v57 = vcombine.high %v973_v49, %v977_v53  ;;  %v981_v59 = vld [vmem:[%s4655_s1 + $0x250] sm:$0xff] }
 0x24d   : > { %3117 = vmatprep.subr.bf16.mxu1 %v3617_v55  ;;  %3281 = vmatprep.subr.bf16.mxu0 %v3747_v56  ;;  %v1106_v55 = vld [vmem:[%s4655_s1 + $0x638] sm:$0xff]  ;;  %v3664_v56 = vcombine.low %v965_v40, %v969_v42 }
 0x24e   : > { %v3803_v58 = vcombine.high %v1102_v54, %v1106_v55  ;;  %v3802_v0 = vcombine.low %v1102_v54, %v1106_v55  ;;  %v1029_v55 = vld [vmem:[%s4655_s1 + $0x3d0] sm:$0xff] }
 0x24f   : > { %3118 = vmatpush1.bf16.msra.mxu1 %v3616_v60  ;;  %v985_v60 = vld [vmem:[%s4655_s1 + $0x270] sm:$0xff] }
 0x250   : > { %3282 = vmatpush1.bf16.msra.mxu0 %v3746_v61  ;;  %3119 = vmatprep.subr.bf16.mxu1 %v3625_v62  ;;  %v1110_v61 = vld [vmem:[%s4655_s1 + $0x658] sm:$0xff]  ;;  %v3681_v9 = vcombine.high %v981_v59, %v985_v60 }
 0x251   : > { %3283 = vmatprep.subr.bf16.mxu0 %v3755_v63  ;;  %v1114_v62 = vld [vmem:[%s4655_s1 + $0x678] sm:$0xff]  ;;  %v3672_v63 = vcombine.low %v973_v49, %v977_v53 }
 0x252   : > { %v3811_v1 = vcombine.high %v1110_v61, %v1114_v62  ;;  %v3810_v6 = vcombine.low %v1110_v61, %v1114_v62  ;;  %v1037_v62 = vld [vmem:[%s4655_s1 + $0x410] sm:$0xff] }
 0x253   : > { %3120 = vmatpush1.bf16.msra.mxu1 %v3624_v3  ;;  %v993_v3 = vld [vmem:[%s4655_s1 + $0x2b0] sm:$0xff] }
 0x254   : > { %3284 = vmatpush1.bf16.msra.mxu0 %v3754_v41  ;;  %3121 = vmatprep.subr.bf16.mxu1 %v3633_v4  ;;  %v1118_v41 = vld [vmem:[%s4655_s1 + $0x698] sm:$0xff]  ;;  %v3689_v7 = vcombine.high %v989_v2, %v993_v3 }
 0x255   : > { %3285 = vmatprep.subr.bf16.mxu0 %v3763_v5  ;;  %v1122_v4 = vld [vmem:[%s4655_s1 + $0x6b8] sm:$0xff]  ;;  %v3680_v5 = vcombine.low %v981_v59, %v985_v60 }
 0x256   : > { %v3819_v8 = vcombine.high %v1118_v41, %v1122_v4  ;;  %v3818_v16 = vcombine.low %v1118_v41, %v1122_v4  ;;  %v1045_v4 = vld [vmem:[%s4655_s1 + $0x450] sm:$0xff] }
 0x257   : > { %3122 = vmatpush1.bf16.msra.mxu1 %v3632_v11  ;;  %v1001_v11 = vld [vmem:[%s4655_s1 + $0x2f0] sm:$0xff] }
 0x258   : > { %3286 = vmatpush1.bf16.msra.mxu0 %v3762_v13  ;;  %3123 = vmatprep.subr.bf16.mxu1 %v3641_v14  ;;  %v1126_v13 = vld [vmem:[%s4655_s1 + $0x6d8] sm:$0xff]  ;;  %v3697_v17 = vcombine.high %v997_v10, %v1001_v11 }
 0x259   : > { %3287 = vmatprep.subr.bf16.mxu0 %v3771_v15  ;;  %v1130_v14 = vld [vmem:[%s4655_s1 + $0x6f8] sm:$0xff]  ;;  %v3688_v15 = vcombine.low %v989_v2, %v993_v3 }
 0x25a   : > { %v3827_v18 = vcombine.high %v1126_v13, %v1130_v14  ;;  %v3826_v29 = vcombine.low %v1126_v13, %v1130_v14  ;;  %v1053_v14 = vld [vmem:[%s4655_s1 + $0x490] sm:$0xff] }
 0x25b   : > { %3124 = vmatpush1.bf16.msra.mxu1 %v3640_v20  ;;  %v1009_v20 = vld [vmem:[%s4655_s1 + $0x330] sm:$0xff] }
 0x25c   : > { %3288 = vmatpush1.bf16.msra.mxu0 %v3770_v21  ;;  %3125 = vmatprep.subr.bf16.mxu1 %v3649_v27  ;;  %v1134_v21 = vld [vmem:[%s4655_s1 + $0x718] sm:$0xff]  ;;  %v3705_v30 = vcombine.high %v1005_v19, %v1009_v20 }
 0x25d   : > { %3289 = vmatprep.subr.bf16.mxu0 %v3779_v28  ;;  %v1138_v27 = vld [vmem:[%s4655_s1 + $0x738] sm:$0xff]  ;;  %v3696_v28 = vcombine.low %v997_v10, %v1001_v11 }
 0x25e   : > { %v3835_v31 = vcombine.high %v1134_v21, %v1138_v27  ;;  %v3834_v40 = vcombine.low %v1134_v21, %v1138_v27  ;;  %v1061_v27 = vld [vmem:[%s4655_s1 + $0x4d0] sm:$0xff] }
 0x25f   : > { %3126 = vmatpush1.bf16.msra.mxu1 %v3648_v33  ;;  %v1017_v33 = vld [vmem:[%s4655_s1 + $0x370] sm:$0xff] }
 0x260   : > { %3290 = vmatpush1.bf16.msra.mxu0 %v3778_v36  ;;  %3127 = vmatprep.subr.bf16.mxu1 %v3657_v38  ;;  %v1142_v36 = vld [vmem:[%s4655_s1 + $0x758] sm:$0xff]  ;;  %v3713_v42 = vcombine.high %v1013_v32, %v1017_v33 }
 0x261   : > { %3291 = vmatprep.subr.bf16.mxu0 %v3787_v39  ;;  %v1146_v38 = vld [vmem:[%s4655_s1 + $0x778] sm:$0xff]  ;;  %v3704_v39 = vcombine.low %v1005_v19, %v1009_v20 }
 0x262   : > { %v3843_v44 = vcombine.high %v1142_v36, %v1146_v38  ;;  %v3842_v49 = vcombine.low %v1142_v36, %v1146_v38  ;;  %v1073_v36 = vld [vmem:[%s4655_s1 + $0x530] sm:$0xff]  ;;  %v1198_v38 = vld [vmem:[%s4655_s1 + $0x918] sm:$0xff] }
 0x263   : > { %3128 = vmatpush1.bf16.msra.mxu1 %v3656_v46  ;;  %v1025_v46 = vld [vmem:[%s4655_s1 + $0x3b0] sm:$0xff] }
 0x264   : > { %3292 = vmatpush1.bf16.msra.mxu0 %v3786_v47  ;;  %3129 = vmatprep.subr.bf16.mxu1 %v3665_v51  ;;  %v1150_v47 = vld [vmem:[%s4655_s1 + $0x798] sm:$0xff]  ;;  %v3721_v53 = vcombine.high %v1021_v45, %v1025_v46 }
 0x265   : > { %3293 = vmatprep.subr.bf16.mxu0 %v3795_v48  ;;  %v1154_v51 = vld [vmem:[%s4655_s1 + $0x7b8] sm:$0xff]  ;;  %v3712_v48 = vcombine.low %v1013_v32, %v1017_v33  ;;  %v1069_v33 = vld [vmem:[%s4655_s1 + $0x510] sm:$0xff] }
 0x266   : > { %v3851_v54 = vcombine.high %v1150_v47, %v1154_v51  ;;  %v3850_v59 = vcombine.low %v1150_v47, %v1154_v51  ;;  %v1081_v47 = vld [vmem:[%s4655_s1 + $0x570] sm:$0xff]  ;;  %v1206_v51 = vld [vmem:[%s4655_s1 + $0x958] sm:$0xff] }
 0x267   : > { %3130 = vmatpush1.bf16.msra.mxu1 %v3664_v56  ;;  %v1033_v56 = vld [vmem:[%s4655_s1 + $0x3f0] sm:$0xff] }
 0x268   : > { %3294 = vmatpush1.bf16.msra.mxu0 %v3794_v24  ;;  %3131 = vmatprep.subr.bf16.mxu1 %v3673_v57  ;;  %v1158_v24 = vld [vmem:[%s4655_s1 + $0x7d8] sm:$0xff]  ;;  %v3729_v60 = vcombine.high %v1029_v55, %v1033_v56 }
 0x269   : > { %3295 = vmatprep.subr.bf16.mxu0 %v3803_v58  ;;  %v1162_v57 = vld [vmem:[%s4655_s1 + $0x7f8] sm:$0xff]  ;;  %v3720_v58 = vcombine.low %v1021_v45, %v1025_v46  ;;  %v1077_v46 = vld [vmem:[%s4655_s1 + $0x550] sm:$0xff] }
 0x26a   : > { %v3859_v61 = vcombine.high %v1158_v24, %v1162_v57  ;;  %v3858_v2 = vcombine.low %v1158_v24, %v1162_v57  ;;  %v1089_v24 = vld [vmem:[%s4655_s1 + $0x5b0] sm:$0xff]  ;;  %v1214_v57 = vld [vmem:[%s4655_s1 + $0x998] sm:$0xff] }
 0x26b   : > { %3132 = vmatpush1.bf16.msra.mxu1 %v3672_v63  ;;  %v1041_v63 = vld [vmem:[%s4655_s1 + $0x430] sm:$0xff] }
 0x26c   : > { %3296 = vmatpush1.bf16.msra.mxu0 %v3802_v0  ;;  %3133 = vmatprep.subr.bf16.mxu1 %v3681_v9  ;;  %v1166_v0 = vld [vmem:[%s4655_s1 + $0x818] sm:$0xff]  ;;  %v3737_v3 = vcombine.high %v1037_v62, %v1041_v63 }
 0x26d   : > { %3297 = vmatprep.subr.bf16.mxu0 %v3811_v1  ;;  %v1170_v9 = vld [vmem:[%s4655_s1 + $0x838] sm:$0xff]  ;;  %v3728_v1 = vcombine.low %v1029_v55, %v1033_v56  ;;  %v1085_v56 = vld [vmem:[%s4655_s1 + $0x590] sm:$0xff] }
 0x26e   : > { %v3867_v41 = vcombine.high %v1166_v0, %v1170_v9  ;;  %v3866_v10 = vcombine.low %v1166_v0, %v1170_v9  ;;  %v1097_v0 = vld [vmem:[%s4655_s1 + $0x5f0] sm:$0xff]  ;;  %v1222_v9 = vld [vmem:[%s4655_s1 + $0x9d8] sm:$0xff] }
 0x26f   : > { %3134 = vmatpush1.bf16.msra.mxu1 %v3680_v5  ;;  %v1049_v5 = vld [vmem:[%s4655_s1 + $0x470] sm:$0xff] }
 0x270   : > { %3298 = vmatpush1.bf16.msra.mxu0 %v3810_v6  ;;  %3135 = vmatprep.subr.bf16.mxu1 %v3689_v7  ;;  %v1174_v6 = vld [vmem:[%s4655_s1 + $0x858] sm:$0xff]  ;;  %v3745_v11 = vcombine.high %v1045_v4, %v1049_v5 }
 0x271   : > { %3299 = vmatprep.subr.bf16.mxu0 %v3819_v8  ;;  %v1178_v7 = vld [vmem:[%s4655_s1 + $0x878] sm:$0xff]  ;;  %v3736_v8 = vcombine.low %v1037_v62, %v1041_v63  ;;  %v1093_v63 = vld [vmem:[%s4655_s1 + $0x5d0] sm:$0xff] }
 0x272   : > { %v3875_v13 = vcombine.high %v1174_v6, %v1178_v7  ;;  %v3874_v19 = vcombine.low %v1174_v6, %v1178_v7  ;;  %v1105_v6 = vld [vmem:[%s4655_s1 + $0x630] sm:$0xff]  ;;  %v3792_v7 = vcombine.low %v1093_v63, %v1097_v0 }
 0x273   : > { %3136 = vmatpush1.bf16.msra.mxu1 %v3688_v15  ;;  %v1057_v15 = vld [vmem:[%s4655_s1 + $0x4b0] sm:$0xff] }
 0x274   : > { %3300 = vmatpush1.bf16.msra.mxu0 %v3818_v16  ;;  %3137 = vmatprep.subr.bf16.mxu1 %v3697_v17  ;;  %v1182_v16 = vld [vmem:[%s4655_s1 + $0x898] sm:$0xff]  ;;  %v3753_v20 = vcombine.high %v1053_v14, %v1057_v15 }
 0x275   : > { %3301 = vmatprep.subr.bf16.mxu0 %v3827_v18  ;;  %v1186_v17 = vld [vmem:[%s4655_s1 + $0x8b8] sm:$0xff]  ;;  %v3744_v18 = vcombine.low %v1045_v4, %v1049_v5  ;;  %v1101_v5 = vld [vmem:[%s4655_s1 + $0x610] sm:$0xff] }
 0x276   : > { %v3883_v21 = vcombine.high %v1182_v16, %v1186_v17 }
 0x277   : > { %3138 = vmatpush1.bf16.msra.mxu1 %v3696_v28  ;;  %v1190_v28 = vld [vmem:[%s4655_s1 + $0x8d8] sm:$0xff] }
 0x278   : > { %3302 = vmatpush1.bf16.msra.mxu0 %v3826_v29  ;;  %3139 = vmatprep.subr.bf16.mxu1 %v3705_v30  ;;  %v1194_v29 = vld [vmem:[%s4655_s1 + $0x8f8] sm:$0xff]  ;;  %v3752_v30 = vcombine.low %v1053_v14, %v1057_v15  ;;  %v3800_v14 = vcombine.low %v1101_v5, %v1105_v6 }
 0x279   : > { %3303 = vmatprep.subr.bf16.mxu0 %v3835_v31  ;;  %v3891_v32 = vcombine.high %v1190_v28, %v1194_v29 }
 0x27b   : > { %3140 = vmatpush1.bf16.msra.mxu1 %v3704_v39  ;;  %v1202_v39 = vld [vmem:[%s4655_s1 + $0x938] sm:$0xff] }
 0x27c   : > { %3304 = vmatpush1.bf16.msra.mxu0 %v3834_v40  ;;  %3141 = vmatprep.subr.bf16.mxu1 %v3713_v42  ;;  %v3890_v42 = vcombine.low %v1190_v28, %v1194_v29  ;;  %v3899_v45 = vcombine.high %v1198_v38, %v1202_v39  ;;  %v1133_v28 = vld [vmem:[%s4655_s1 + $0x710] sm:$0xff] }
 0x27d   : > { %3305 = vmatprep.subr.bf16.mxu0 %v3843_v44  ;;  %v3769_v44 = vcombine.high %v1069_v33, %v1073_v36  ;;  %v1137_v29 = vld [vmem:[%s4655_s1 + $0x730] sm:$0xff] }
 0x27f   : > { %3142 = vmatpush1.bf16.msra.mxu1 %v3712_v48  ;;  %v1210_v48 = vld [vmem:[%s4655_s1 + $0x978] sm:$0xff] }
 0x280   : > { %3306 = vmatpush1.bf16.msra.mxu0 %v3842_v49  ;;  %3143 = vmatprep.subr.bf16.mxu1 %v3721_v53  ;;  %v3768_v49 = vcombine.low %v1069_v33, %v1073_v36  ;;  %v3898_v53 = vcombine.low %v1198_v38, %v1202_v39  ;;  %v3907_v55 = vcombine.high %v1206_v51, %v1210_v48  ;;  %v1149_v38 = vld [vmem:[%s4655_s1 + $0x790] sm:$0xff] }
 0x281   : > { %3307 = vmatprep.subr.bf16.mxu0 %v3851_v54  ;;  %v3777_v54 = vcombine.high %v1077_v46, %v1081_v47  ;;  %v3832_v33 = vcombine.low %v1133_v28, %v1137_v29  ;;  %v1153_v39 = vld [vmem:[%s4655_s1 + $0x7b0] sm:$0xff] }
 0x283   : > { %3144 = vmatpush1.bf16.msra.mxu1 %v3720_v58  ;;  %v1218_v58 = vld [vmem:[%s4655_s1 + $0x9b8] sm:$0xff] }
 0x284   : > { %3308 = vmatpush1.bf16.msra.mxu0 %v3850_v59  ;;  %3145 = vmatprep.subr.bf16.mxu1 %v3729_v60  ;;  %v3776_v59 = vcombine.low %v1077_v46, %v1081_v47  ;;  %v3906_v60 = vcombine.low %v1206_v51, %v1210_v48  ;;  %v3915_v62 = vcombine.high %v1214_v57, %v1218_v58  ;;  %v1165_v51 = vld [vmem:[%s4655_s1 + $0x810] sm:$0xff] }
 0x285   : > { %3309 = vmatprep.subr.bf16.mxu0 %v3859_v61  ;;  %v3785_v61 = vcombine.high %v1085_v56, %v1089_v24  ;;  %v3848_v46 = vcombine.low %v1149_v38, %v1153_v39  ;;  %v1169_v48 = vld [vmem:[%s4655_s1 + $0x830] sm:$0xff] }
 0x287   : > { %3146 = vmatpush1.bf16.msra.mxu1 %v3728_v1  ;;  %v1226_v1 = vld [vmem:[%s4655_s1 + $0x9f8] sm:$0xff] }
 0x288   : > { %3310 = vmatpush1.bf16.msra.mxu0 %v3858_v2  ;;  %3156 = vmatprep.subr.bf16.mxu1 %v3737_v3  ;;  %v3784_v2 = vcombine.low %v1085_v56, %v1089_v24  ;;  %v3914_v3 = vcombine.low %v1214_v57, %v1218_v58  ;;  %v3923_v4 = vcombine.high %v1222_v9, %v1226_v1  ;;  %v1181_v57 = vld [vmem:[%s4655_s1 + $0x890] sm:$0xff] }
 0x289   : > { %3320 = vmatprep.subr.bf16.mxu0 %v3867_v41  ;;  %v3793_v41 = vcombine.high %v1093_v63, %v1097_v0  ;;  %v3864_v56 = vcombine.low %v1165_v51, %v1169_v48  ;;  %v1185_v58 = vld [vmem:[%s4655_s1 + $0x8b0] sm:$0xff] }
 0x28a   : > { %3148 = vmatmul.mubr.bf16.vlgmr.msra.gmra.mrb[12].mxu1 %v4800_v43  ;;  %v1065_v43 = vld [vmem:[%s4655_s1 + $0x4f0] sm:$0xff]  ;;  %v3880_v63 = vcombine.low %v1181_v57, %v1185_v58 }
 0x28b   : > { %3312 = vmatmul.mubr.bf16.vlgmr.msra.gmra.mrb[12].mxu0 %v4881_v12  ;;  %3157 = vmatpush1.bf16.msra.mxu1 %v3736_v8  ;;  %v3761_v31 = vcombine.high %v1061_v27, %v1065_v43  ;;  %v3760_v40 = vcombine.low %v1061_v27, %v1065_v43  ;;  %v3922_v8 = vcombine.low %v1222_v9, %v1226_v1  ;;  %v1197_v9 = vld [vmem:[%s4655_s1 + $0x910] sm:$0xff] }
 0x28c   : > { %3188 = vmatprep.mubr.bf16.mxu1 %v4825_v26  ;;  %3321 = vmatpush1.bf16.msra.mxu0 %v3866_v10  ;;  %v3882_v26 = vcombine.low %v1182_v16, %v1186_v17  ;;  %v3801_v10 = vcombine.high %v1101_v5, %v1105_v6  ;;  %v1117_v16 = vld [vmem:[%s4655_s1 + $0x690] sm:$0xff] }
 0x28d   : > { %3158 = vmatprep.subr.bf16.mxu1 %v3745_v11  ;;  %3322 = vmatprep.subr.bf16.mxu0 %v3875_v13  ;;  %v1109_v11 = vld [vmem:[%s4655_s1 + $0x650] sm:$0xff] }
 0x28e   : > { %3352 = vmatprep.mubr.bf16.mxu0 %v4390_v52  ;;  %v1113_v13 = vld [vmem:[%s4655_s1 + $0x670] sm:$0xff] }
 0x28f   : > { %3159 = vmatpush1.bf16.msra.mxu1 %v3744_v18  ;;  %v3809_v15 = vcombine.high %v1109_v11, %v1113_v13  ;;  %v1121_v17 = vld [vmem:[%s4655_s1 + $0x6b0] sm:$0xff]  ;;  %v3808_v18 = vcombine.low %v1109_v11, %v1113_v13 }
 0x290   : > { %3323 = vmatpush1.bf16.msra.mxu0 %v3874_v19  ;;  %3160 = vmatprep.subr.bf16.mxu1 %v3753_v20  ;;  %v3817_v19 = vcombine.high %v1117_v16, %v1121_v17  ;;  %v1125_v20 = vld [vmem:[%s4655_s1 + $0x6d0] sm:$0xff]  ;;  %v3816_v27 = vcombine.low %v1117_v16, %v1121_v17 }
 0x291   : > { %3324 = vmatprep.subr.bf16.mxu0 %v3883_v21  ;;  %v1129_v21 = vld [vmem:[%s4655_s1 + $0x6f0] sm:$0xff] }
 0x292   : > { %v3825_v43 = vcombine.high %v1125_v20, %v1129_v21  ;;  %v1201_v1 = vld [vmem:[%s4655_s1 + $0x930] sm:$0xff] }
 0x293   : > { %3161 = vmatpush1.bf16.msra.mxu1 %v3752_v30  ;;  %v3824_v30 = vcombine.low %v1125_v20, %v1129_v21  ;;  %v1213_v5 = vld [vmem:[%s4655_s1 + $0x990] sm:$0xff]  ;;  %v1227_v20 = vld [vmem:[%s286_s3] sm:$0xff] }
 0x294   : > { %3325 = vmatpush1.bf16.msra.mxu0 %v3882_v26  ;;  %3162 = vmatprep.subr.bf16.mxu1 %v3761_v31  ;;  %v3833_v26 = vcombine.high %v1133_v28, %v1137_v29  ;;  %v1141_v31 = vld [vmem:[%s4655_s1 + $0x750] sm:$0xff]  ;;  %v1232_v21 = vrot.slane %v1227_v20, %v407_v23  ;;  %v1244_v23 = vrot.slane %v1227_v20, %v419_v34 }
 0x295   : > { %3326 = vmatprep.subr.bf16.mxu0 %v3891_v32  ;;  %v1145_v32 = vld [vmem:[%s4655_s1 + $0x770] sm:$0xff] }
 0x296   : > { %v3841_v36 = vcombine.high %v1141_v31, %v1145_v32  ;;  %v1217_v6 = vld [vmem:[%s4655_s1 + $0x9b0] sm:$0xff] }
 0x297   : > { %3163 = vmatpush1.bf16.msra.mxu1 %v3760_v40  ;;  %v3840_v40 = vcombine.low %v1141_v31, %v1145_v32  ;;  %v1221_v11 = vld [vmem:[%s4655_s1 + $0x9d0] sm:$0xff]  ;;  %v3912_v16 = vcombine.low %v1213_v5, %v1217_v6 }
 0x298   : > { %3327 = vmatpush1.bf16.msra.mxu0 %v3890_v42  ;;  %3164 = vmatprep.subr.bf16.mxu1 %v3769_v44  ;;  %v3849_v42 = vcombine.high %v1149_v38, %v1153_v39  ;;  %v1157_v44 = vld [vmem:[%s4655_s1 + $0x7d0] sm:$0xff] }
 0x299   : > { %3328 = vmatprep.subr.bf16.mxu0 %v3899_v45  ;;  %v1161_v45 = vld [vmem:[%s4655_s1 + $0x7f0] sm:$0xff] }
 0x29a   : > { %v3857_v47 = vcombine.high %v1157_v44, %v1161_v45  ;;  %v1225_v13 = vld [vmem:[%s4655_s1 + $0x9f0] sm:$0xff] }
 0x29b   : > { %3165 = vmatpush1.bf16.msra.mxu1 %v3768_v49  ;;  %v3856_v49 = vcombine.low %v1157_v44, %v1161_v45 }
 0x29c   : > { %3329 = vmatpush1.bf16.msra.mxu0 %v3898_v53  ;;  %3166 = vmatprep.subr.bf16.mxu1 %v3777_v54  ;;  %v3865_v53 = vcombine.high %v1165_v51, %v1169_v48  ;;  %v1173_v54 = vld [vmem:[%s4655_s1 + $0x850] sm:$0xff] }
 0x29d   : > { %3330 = vmatprep.subr.bf16.mxu0 %v3907_v55  ;;  %v1177_v55 = vld [vmem:[%s4655_s1 + $0x870] sm:$0xff] }
 0x29e   : > { %v3873_v24 = vcombine.high %v1173_v54, %v1177_v55 }
 0x29f   : > { %3167 = vmatpush1.bf16.msra.mxu1 %v3776_v59  ;;  %v3872_v59 = vcombine.low %v1173_v54, %v1177_v55 }
 0x2a0   : > { %3331 = vmatpush1.bf16.msra.mxu0 %v3906_v60  ;;  %3168 = vmatprep.subr.bf16.mxu1 %v3785_v61  ;;  %v3881_v60 = vcombine.high %v1181_v57, %v1185_v58  ;;  %v1189_v61 = vld [vmem:[%s4655_s1 + $0x8d0] sm:$0xff]  ;;  %v1248_v57 = vrot.slane %v1227_v20, %v423_v37 }
 0x2a1   : > { %3332 = vmatprep.subr.bf16.mxu0 %v3915_v62  ;;  %v1193_v62 = vld [vmem:[%s4655_s1 + $0x8f0] sm:$0xff] }
 0x2a2   : > { %v3889_v0 = vcombine.high %v1189_v61, %v1193_v62 }
 0x2a3   : > { %3169 = vmatpush1.bf16.msra.mxu1 %v3784_v2  ;;  %v3897_v2 = vcombine.high %v1197_v9, %v1201_v1 }
 0x2a4   : > { %3333 = vmatpush1.bf16.msra.mxu0 %v3914_v3  ;;  %3170 = vmatprep.subr.bf16.mxu1 %v3793_v41  ;;  %v1209_v3 = vld [vmem:[%s4655_s1 + $0x970] sm:$0xff]  ;;  %v3896_v41 = vcombine.low %v1197_v9, %v1201_v1 }
 0x2a5   : > { %3334 = vmatprep.subr.bf16.mxu0 %v3923_v4 }
 0x2a7   : > { %3171 = vmatpush1.bf16.msra.mxu1 %v3792_v7 }
 0x2a8   : > { %3335 = vmatpush1.bf16.msra.mxu0 %v3922_v8  ;;  %3172 = vmatprep.subr.bf16.mxu1 %v3801_v10  ;;  %v3913_v8 = vcombine.high %v1213_v5, %v1217_v6 }
 0x2ab   : > { %3353 = vmatmul.mubr.bf16.vlgmr.msra.gmra.mrb[12].mxu0 %v4926_v35  ;;  %3173 = vmatpush1.bf16.msra.mxu1 %v3800_v14 }
 0x2ac   : > { %3174 = vmatprep.subr.bf16.mxu1 %v3809_v15 }
 0x2af   : > { %3175 = vmatpush1.bf16.msra.mxu1 %v3808_v18  ;;  %v3921_v18 = vcombine.high %v1221_v11, %v1225_v13 }
 0x2b0   : > { %3176 = vmatprep.subr.bf16.mxu1 %v3817_v19  ;;  %v3920_v19 = vcombine.low %v1221_v11, %v1225_v13 }
 0x2b3   : > { %3177 = vmatpush1.bf16.msra.mxu1 %v3816_v27  ;;  %v1236_v27 = vrot.slane %v1227_v20, %v411_v25 }
 0x2b4   : > { %3178 = vmatprep.subr.bf16.mxu1 %v3825_v43 }
 0x2b7   : > { %3179 = vmatpush1.bf16.msra.mxu1 %v3824_v30 }
 0x2b8   : > { %3180 = vmatprep.subr.bf16.mxu1 %v3833_v26 }
 0x2bb   : > { %3181 = vmatpush1.bf16.msra.mxu1 %v3832_v33 }
 0x2bc   : > { %3182 = vmatprep.subr.bf16.mxu1 %v3841_v36 }
 0x2bf   : > { %3183 = vmatpush1.bf16.msra.mxu1 %v3840_v40 }
 0x2c0   : > { %3184 = vmatprep.subr.bf16.mxu1 %v3849_v42 }
 0x2c3   : > { %3185 = vmatpush1.bf16.msra.mxu1 %v3848_v46  ;;  %v1255_v46 = vsub.s32 6, %v4778_v22 }
 0x2c4   : > { %3186 = vmatprep.subr.bf16.mxu1 %v3857_v47  ;;  %v1259_v47 = vsub.s32 7, %v4778_v22 }
 0x2c5   : > { %v1256_v51 = vrot.slane %v1227_v20, %v1255_v46 }
 0x2c7   : > { %3187 = vmatpush1.bf16.msra.mxu1 %v3856_v49 }
 0x2c8   : > { %3197 = vmatprep.subr.bf16.mxu1 %v3865_v53 }
 0x2ca   : > { %3189 = vmatmul.mubr.bf16.vlgmr.msra.gmra.mrb[12].mxu1 %v4881_v12  ;;  %v3888_v12 = vcombine.low %v1189_v61, %v1193_v62 }
 0x2cb   : > { %3198 = vmatpush1.bf16.msra.mxu1 %v3864_v56  ;;  %3229 = vmatprep.mubr.bf16.mxu1 %v4390_v52  ;;  %v1205_v52 = vld [vmem:[%s4655_s1 + $0x950] sm:$0xff] }
 0x2cc   : > { %3199 = vmatprep.subr.bf16.mxu1 %v3873_v24  ;;  %v3905_v4 = vcombine.high %v1205_v52, %v1209_v3  ;;  %v3904_v7 = vcombine.low %v1205_v52, %v1209_v3  ;;  %v1251_v24 = vsub.s32 5, %v4778_v22 }
 0x2ce   : > { %v1252_v58 = vrot.slane %v1227_v20, %v1251_v24 }
 0x2cf   : > { %3200 = vmatpush1.bf16.msra.mxu1 %v3872_v59 }
 0x2d0   : > { %3201 = vmatprep.subr.bf16.mxu1 %v3881_v60 }
 0x2d3   : > { %3202 = vmatpush1.bf16.msra.mxu1 %v3880_v63 }
 0x2d4   : > { %3203 = vmatprep.subr.bf16.mxu1 %v3889_v0 }
 0x2d7   : > { %3204 = vmatpush1.bf16.msra.mxu1 %v3888_v12 }
 0x2d8   : > { %3205 = vmatprep.subr.bf16.mxu1 %v3897_v2 }
 0x2db   : > { %3206 = vmatpush1.bf16.msra.mxu1 %v3896_v41 }
 0x2dc   : > { %3207 = vmatprep.subr.bf16.mxu1 %v3905_v4 }
 0x2dd   : > { %v3067_v10 = vpop.f32.mrb[8].mxu0 }
 0x2de   : > { %v3069_v14 = vpop.f32.mrb[9].mxu0 }
 0x2df   : > { %v3071_v15 = vpop.f32.mrb[10].mxu0  ;;  %3208 = vmatpush1.bf16.msra.mxu1 %v3904_v7  ;;  %v3936_v33 = vadd.f32 %v3069_v14, %v1244_v23 }
 0x2e0   : > { %v3072_v17 = vpop.f32.mrb[11].mxu0  ;;  %3209 = vmatprep.subr.bf16.mxu1 %v3913_v8 }
 0x2e3   : > { %3210 = vmatpush1.bf16.msra.mxu1 %v3912_v16 }
 0x2e4   : > { %3211 = vmatprep.subr.bf16.mxu1 %v3921_v18 }
 0x2e7   : > { %3212 = vmatpush1.bf16.msra.mxu1 %v3920_v19 }
 0x2ea   : > { %3230 = vmatmul.mubr.bf16.vlgmr.msra.gmra.mrb[12].mxu1 %v4926_v35  ;;  %v1240_v35 = vrot.slane %v1227_v20, %v415_v50  ;;  %v1260_v50 = vrot.slane %v1227_v20, %v1259_v47 }
 0x2ec   : > { %v3934_v25 = vadd.f32 %v3067_v10, %v1240_v35 }
 0x2fd   : > { %v2985_v43 = vpop.f32.mrb[4].mxu1 }
 0x2fe   : > { %v3932_v28 = vadd.f32 %v2985_v43, %v1232_v21  ;;  %v2987_v29 = vpop.f32.mrb[5].mxu1 }
 0x2ff   : > { %v3933_v30 = vadd.f32 %v2987_v29, %v1236_v27  ;;  %v2989_v26 = vpop.f32.mrb[6].mxu1 }
 0x300   : > { %v2990_v31 = vpop.f32.mrb[7].mxu1 }
 0x301   : > { %v3369_v32 = vcombine.low %v3932_v28, %v3933_v30 }
 0x303   : > { %3377 = vst [vmem:[%s5100_s12] sm:$0xff] %v3369_v32 }
 0x31d   : > { %v3108_v36 = vpop.f32.mrb[8].mxu1 }
 0x31e   : > { %v3935_v38 = vadd.f32 %v3934_v25, %v3108_v36  ;;  %v3110_v39 = vpop.f32.mrb[9].mxu1 }
 0x31f   : > { %v3937_v40 = vadd.f32 %v3936_v33, %v3110_v39  ;;  %v3112_v42 = vpop.f32.mrb[10].mxu1 }
 0x320   : > { %v3113_v44 = vpop.f32.mrb[11].mxu1 }
 0x321   : > { %v3370_v45 = vcombine.low %v3935_v38, %v3937_v40 }
 0x323   : > { %3378 = vst [vmem:[%s5100_s12 + $0x8] sm:$0xff] %v3370_v45 }
 0x37e   : > { %v3354_v34 = vpop.f32.mrb[12].mxu0 }
 0x37f   : > { %v3940_v48 = vadd.f32 %v3354_v34, %v1256_v51  ;;  %v3356_v49 = vpop.f32.mrb[13].mxu0 }
 0x380   : > { %v3941_v53 = vadd.f32 %v3356_v49, %v1260_v50  ;;  %v3358_v54 = vpop.f32.mrb[14].mxu0 }
 0x381   : > { %v3359_v55 = vpop.f32.mrb[15].mxu0 }
 0x382   : > { %v3372_v56 = vcombine.low %v3940_v48, %v3941_v53 }
 0x384   : > { %3380 = vst [vmem:[%s5100_s12 + $0x18] sm:$0xff] %v3372_v56 }
 0x3bd   : > { %v3231_v59 = vpop.f32.mrb[12].mxu1 }
 0x3be   : > { %v3938_v60 = vadd.f32 %v3231_v59, %v1248_v57  ;;  %v3233_v61 = vpop.f32.mrb[13].mxu1 }
 0x3bf   : > { %v3939_v62 = vadd.f32 %v3233_v61, %v1252_v58  ;;  %v3235_v63 = vpop.f32.mrb[14].mxu1 }
 0x3c0   : > { %v3236_v0 = vpop.f32.mrb[15].mxu1 }
 0x3c1   : > { %v3371_v9 = vcombine.low %v3938_v60, %v3939_v62 }
 0x3c3   : > { %3379 = vst [vmem:[%s5100_s12 + $0x10] sm:$0xff] %v3371_v9 }
 0x3c4   : > { %4317 = shalt.err (!%p4314_p6)
}
 0x3c5   : > { %s4318_s27 = scalar_lea.hbm %s5119_s25, 512  ;;  %s4322_s15 = scalar_lea.hbm %s5169_s5, 1024 }
 0x3c6   : > { %p4319_p1 = scmp.ne.s32.totalorder %s5119_s25, %s4318_s27  ;;  %p4323_p11 = scmp.lt.u32.totalorder %s5119_s25, %s5169_s5 }
 0x3c7   : > { %p4324_p13 = scmp.lt.u32.totalorder %s4322_s15, %s4318_s27  ;;  %p4326_p7 = scmp.lt.u32.totalorder %s4318_s27, %s5119_s25 }
 0x3c8   : > { %p4320_p0 = pnand %p4319_p1, %p5208_p9 }
 0x3c9   : > { %p4325_p3 = por %p4324_p13, %p4323_p11 }
 0x3ca   : > { %p4321_p5 = pneg %p4320_p0 }
 0x3cb   : > { %p4327_p12 = por %p4326_p7, %p4325_p3 }
 0x3cd   : > { %p4328_p8 = pnand %p4327_p12, %p4321_p5 }
 0x3cf   : > { %4331 = shalt.err (!%p4328_p8)
}
 0x3d0   : > { %3988 = dma.vmem_to_hbm [thread:$0]  (%p5208_p9), %s5121_s13, 512, %s5119_s25, %s3382_s23  }
 0x3d1 PF: > { %s5209_s9 = sld [smem:[#allocation18_spill]]  ;;  %s3408_s1 = sand.u32 1, %s4366_s18  }
 0x3d2   : > { %p5211_p2 = scmp.ge.s32.totalorder %s4378_s21, 2  ;;  %s3409_s29 = scalar_lea.sflag [#allocation4], %s3408_s1 }
 0x3d7   : > { %p5210_p10 = scmp.ne.s32.totalorder %s5209_s9, 0 }
 0x3d9   : > { %p4008_p4 = pnand %p5211_p2, %p5210_p10 }
 0x3db   : > { %4361 = dma.done.wait (!%p4008_p4), %s3409_s29, 512  }
 0x3dc   : > { %4363 = vsyncadd (!%p4008_p4), %s3409_s29, 4294966784  ;;  %s5212_s21 = sld [smem:[#allocation16_spill]]  ;;  %s5213_s3 = sld [smem:[#allocation17_spill]] }
 0x3dd   : > { %s5214_s18 = smov %s4370_s19  ;;  %s5215_s19 = smov %s4374_s20 }
 0x3e2   : > { %p20_p6 = scmp.ge.s32.totalorder %s5212_s21, 4   ;;  %s5216_s20 = smov %s5213_s3 }
 0x3e4   :  { %22 = sbr.rel (!%p20_p6) target bundleno = 10 (0xa), region = 109 }
 0x3eb   :  { %3414 = vsyncpa [#allocation3], 1 }
 0x3ec   :  { %3416 = vsyncpa [#allocation3 + $0x1], 1 }
 0x3ed   :  { %3417 = vsyncpa [#allocation6], 1 }
 0x3ee   :  { %3418 = vsyncpa [#allocation9], 1 }
 0x3ef   :  { %3420 = vsyncpa [#allocation9 + $0x1], 1 }
 0x3f0   :  { %3421 = vsyncpa [#allocation4], 1 }
 0x3f1   :  { %3423 = vsyncpa [#allocation4 + $0x1], 1 }

</bundles_post_ra>
